<compile_context>
chip_gen: v5e
topology: v5e:2x2
jax: 0.10.0
libtpu: 0.0.40
codegen_flags: <defaults>
</compile_context>

<pallas_src>
import jax
import jax.numpy as jnp
from jax.experimental import pallas as pl
from jax.experimental.pallas import tpu as pltpu


def _round_up(x, m):
    return ((x + m - 1) // m) * m


def mlp_kernel(x_ref, w1_ref, b1_ref, w2_ref, b2_ref, w3_ref, b3_ref, o_ref):
    # Layer 1: (TB, 896)bf16 @ (896, 512)bf16 -> f32 acc, + bias, ReLU
    h1 = jnp.dot(x_ref[...], w1_ref[...], preferred_element_type=jnp.float32)
    h1 = jnp.maximum(h1 + b1_ref[...], 0.0)
    # Layer 2: (TB, 512)bf16 @ (512, 512)bf16 -> f32 acc, + bias, ReLU
    h2 = jnp.dot(h1.astype(jnp.bfloat16), w2_ref[...],
                 preferred_element_type=jnp.float32)
    h2 = jnp.maximum(h2 + b2_ref[...], 0.0)
    # Layer 3: (TB, 512)bf16 @ (512, 128)bf16 -> f32 acc, + bias
    logits = jnp.dot(h2.astype(jnp.bfloat16), w3_ref[...],
                     preferred_element_type=jnp.float32)
    o_ref[...] = (logits + b3_ref[...]).astype(o_ref.dtype)


def mlp_forward(x_flat, w1, b1, w2, b2, w3, b3):
    """x_flat: (B, 784) f32; weights (in, out) f32; biases (1, out) f32."""
    B, D_in = x_flat.shape          # (B, 784)
    H = w1.shape[1]                 # 512
    D_out = w3.shape[1]             # 10

    # Lane-friendly padded dims.
    K_pad = _round_up(D_in, 128)    # 784 -> 896
    N_pad = _round_up(D_out, 128)   # 10  -> 128

    # Batch tile: saturate MXU rows for big batches, round small batches to sublanes.
    TB = 256 if B >= 256 else _round_up(B, 8)
    B_pad = _round_up(B, TB)
    n_tiles = B_pad // TB

    # Host-side prep: pad + cast MXU operands to bf16; biases stay f32.
    x_p = jnp.pad(x_flat, ((0, B_pad - B), (0, K_pad - D_in))).astype(jnp.bfloat16)
    w1_p = jnp.pad(w1, ((0, K_pad - D_in), (0, 0))).astype(jnp.bfloat16)
    w2_p = w2.astype(jnp.bfloat16)
    w3_p = jnp.pad(w3, ((0, 0), (0, N_pad - D_out))).astype(jnp.bfloat16)
    b1_p = b1.astype(jnp.float32)
    b2_p = b2.astype(jnp.float32)
    b3_p = jnp.pad(b3, ((0, 0), (0, N_pad - D_out))).astype(jnp.float32)

    pinned = lambda shape: pl.BlockSpec(shape, lambda i: tuple(0 for _ in shape))

    out_padded = pl.pallas_call(
        mlp_kernel,
        out_shape=jax.ShapeDtypeStruct((B_pad, N_pad), jnp.float32),
        grid=(n_tiles,),
        in_specs=[
            pl.BlockSpec((TB, K_pad), lambda i: (i, 0)),   # activation tile (pipelined)
            pinned((K_pad, H)), pinned((1, H)),            # layer 1 (VMEM-resident)
            pinned((H, H)),     pinned((1, H)),            # layer 2
            pinned((H, N_pad)), pinned((1, N_pad)),        # layer 3
        ],
        out_specs=pl.BlockSpec((TB, N_pad), lambda i: (i, 0)),
        compiler_params=pltpu.CompilerParams(
            dimension_semantics=("parallel",),
            vmem_limit_bytes=32 << 20,
        ),
    )(x_p, w1_p, b1_p, w2_p, b2_p, w3_p, b3_p)

    # Strip batch and output-feature padding.
    return out_padded[:B, :D_out]


def init_params(key):
    """Deterministic init mimicking PyTorch nn.Linear (uniform +-1/sqrt(fan_in))."""
    def linear(key, fan_in, fan_out):
        kw, kb = jax.random.split(key)
        bound = 1.0 / jnp.sqrt(fan_in)
        w = jax.random.uniform(kw, (fan_in, fan_out), jnp.float32, -bound, bound)
        b = jax.random.uniform(kb, (1, fan_out), jnp.float32, -bound, bound)
        return w, b

    k1, k2, k3 = jax.random.split(key, 3)
    w1, b1 = linear(k1, 28 * 28, 512)
    w2, b2 = linear(k2, 512, 512)
    w3, b3 = linear(k3, 512, 10)
    return w1, b1, w2, b2, w3, b3


def my_model(x_nchw, params):
    # nn.Flatten(): keep batch dim, flatten the rest (NCHW -> (B, C*H*W)).
    B = x_nchw.shape[0]
    x_flat = x_nchw.reshape(B, -1).astype(jnp.float32)
    return mlp_forward(x_flat, *params)


if __name__ == "__main__":
    key = jax.random.PRNGKey(0)
    k_params, k_x = jax.random.split(key)

    params = init_params(k_params)
    x = jax.random.normal(k_x, (8, 1, 28, 28), jnp.float32)  # small batch, MNIST-shaped

    logits = my_model(x, params)
    jax.block_until_ready(logits)
    assert logits.shape == (8, 10)

    # Reference following the same bf16-input / f32-accumulate numeric path.
    w1, b1, w2, b2, w3, b3 = params
    xf = x.reshape(x.shape[0], -1).astype(jnp.float32)
    ref = jnp.dot(xf.astype(jnp.bfloat16), w1.astype(jnp.bfloat16),
                  preferred_element_type=jnp.float32) + b1
    ref = jnp.maximum(ref, 0.0)
    ref = jnp.dot(ref.astype(jnp.bfloat16), w2.astype(jnp.bfloat16),
                  preferred_element_type=jnp.float32) + b2
    ref = jnp.maximum(ref, 0.0)
    ref = jnp.dot(ref.astype(jnp.bfloat16), w3.astype(jnp.bfloat16),
                  preferred_element_type=jnp.float32) + b3
    assert jnp.allclose(logits, ref, atol=1e-2, rtol=1e-2), (
        float(jnp.max(jnp.abs(logits - ref))))

    print("KERNEL_OK")
</pallas_src>

<mosaic_0001>
module attributes {stable_mosaic.version = 11 : i64} {
  func.func @mlp_kernel(%arg0: i32, %arg1: memref<8x896xbf16, #tpu.memory_space<vmem>>, %arg2: memref<896x512xbf16, #tpu.memory_space<vmem>>, %arg3: memref<1x512xf32, #tpu.memory_space<vmem>>, %arg4: memref<512x512xbf16, #tpu.memory_space<vmem>>, %arg5: memref<1x512xf32, #tpu.memory_space<vmem>>, %arg6: memref<512x128xbf16, #tpu.memory_space<vmem>>, %arg7: memref<1x128xf32, #tpu.memory_space<vmem>>, %arg8: memref<8x128xf32, #tpu.memory_space<vmem>>) attributes {dimension_semantics = [#tpu.dimension_semantics<parallel>], iteration_bounds = array<i64: 1>, scalar_prefetch = 0 : i64, scratch_operands = 0 : i64, tpu.core_type = #tpu.core_type<tc>, window_params = [{transform_indices = @transform_0, window_bounds = array<i64: 8, 896>}, {pipeline_mode = #tpu.pipeline_mode<synchronous>, transform_indices = @transform_1, window_bounds = array<i64: 896, 512>}, {pipeline_mode = #tpu.pipeline_mode<synchronous>, transform_indices = @transform_2, window_bounds = array<i64: 1, 512>}, {pipeline_mode = #tpu.pipeline_mode<synchronous>, transform_indices = @transform_3, window_bounds = array<i64: 512, 512>}, {pipeline_mode = #tpu.pipeline_mode<synchronous>, transform_indices = @transform_4, window_bounds = array<i64: 1, 512>}, {pipeline_mode = #tpu.pipeline_mode<synchronous>, transform_indices = @transform_5, window_bounds = array<i64: 512, 128>}, {pipeline_mode = #tpu.pipeline_mode<synchronous>, transform_indices = @transform_6, window_bounds = array<i64: 1, 128>}, {transform_indices = @transform_7, window_bounds = array<i64: 8, 128>}]} {
    %c0 = arith.constant 0 : index
    %c0_0 = arith.constant 0 : index
    %0 = vector.load %arg1[%c0, %c0_0] : memref<8x896xbf16, #tpu.memory_space<vmem>>, vector<8x896xbf16>
    %c0_1 = arith.constant 0 : index
    %c0_2 = arith.constant 0 : index
    %1 = vector.load %arg2[%c0_1, %c0_2] : memref<896x512xbf16, #tpu.memory_space<vmem>>, vector<896x512xbf16>
    %cst = arith.constant dense<0.000000e+00> : vector<8x512xf32>
    %2 = tpu.matmul %0, %1, %cst {dimension_numbers = #tpu.dot_dimension_numbers<[1], [0], [0], [1], [0, 0, 1, 1], [], []>} : vector<8x896xbf16>, vector<896x512xbf16>, vector<8x512xf32> -> vector<8x512xf32>
    %c0_3 = arith.constant 0 : index
    %c0_4 = arith.constant 0 : index
    %3 = vector.load %arg3[%c0_3, %c0_4] : memref<1x512xf32, #tpu.memory_space<vmem>>, vector<1x512xf32>
    %4 = vector.broadcast %3 : vector<1x512xf32> to vector<8x512xf32>
    %5 = arith.addf %2, %4 : vector<8x512xf32>
    %cst_5 = arith.constant 0.000000e+00 : f32
    %6 = vector.broadcast %cst_5 : f32 to vector<8x512xf32>
    %7 = arith.maximumf %5, %6 : vector<8x512xf32>
    %8 = arith.truncf %7 : vector<8x512xf32> to vector<8x512xbf16>
    %c0_6 = arith.constant 0 : index
    %c0_7 = arith.constant 0 : index
    %9 = vector.load %arg4[%c0_6, %c0_7] : memref<512x512xbf16, #tpu.memory_space<vmem>>, vector<512x512xbf16>
    %cst_8 = arith.constant dense<0.000000e+00> : vector<8x512xf32>
    %10 = tpu.matmul %8, %9, %cst_8 {dimension_numbers = #tpu.dot_dimension_numbers<[1], [0], [0], [1], [0, 0, 1, 1], [], []>} : vector<8x512xbf16>, vector<512x512xbf16>, vector<8x512xf32> -> vector<8x512xf32>
    %c0_9 = arith.constant 0 : index
    %c0_10 = arith.constant 0 : index
    %11 = vector.load %arg5[%c0_9, %c0_10] : memref<1x512xf32, #tpu.memory_space<vmem>>, vector<1x512xf32>
    %12 = vector.broadcast %11 : vector<1x512xf32> to vector<8x512xf32>
    %13 = arith.addf %10, %12 : vector<8x512xf32>
    %cst_11 = arith.constant 0.000000e+00 : f32
    %14 = vector.broadcast %cst_11 : f32 to vector<8x512xf32>
    %15 = arith.maximumf %13, %14 : vector<8x512xf32>
    %16 = arith.truncf %15 : vector<8x512xf32> to vector<8x512xbf16>
    %c0_12 = arith.constant 0 : index
    %c0_13 = arith.constant 0 : index
    %17 = vector.load %arg6[%c0_12, %c0_13] : memref<512x128xbf16, #tpu.memory_space<vmem>>, vector<512x128xbf16>
    %cst_14 = arith.constant dense<0.000000e+00> : vector<8x128xf32>
    %18 = tpu.matmul %16, %17, %cst_14 {dimension_numbers = #tpu.dot_dimension_numbers<[1], [0], [0], [1], [0, 0, 1, 1], [], []>} : vector<8x512xbf16>, vector<512x128xbf16>, vector<8x128xf32> -> vector<8x128xf32>
    %c0_15 = arith.constant 0 : index
    %c0_16 = arith.constant 0 : index
    %19 = vector.load %arg7[%c0_15, %c0_16] : memref<1x128xf32, #tpu.memory_space<vmem>>, vector<1x128xf32>
    %20 = vector.broadcast %19 : vector<1x128xf32> to vector<8x128xf32>
    %21 = arith.addf %18, %20 : vector<8x128xf32>
    %c0_17 = arith.constant 0 : index
    %c0_18 = arith.constant 0 : index
    %22 = vector.load %arg8[%c0_17, %c0_18] : memref<8x128xf32, #tpu.memory_space<vmem>>, vector<8x128xf32>
    tpu.vector_store %arg8[%c0_17, %c0_18], %21 {strides = array<i32>} : memref<8x128xf32, #tpu.memory_space<vmem>>, vector<8x128xf32>,
    return
  }
  func.func @transform_0(%arg0: i32) -> (i32, i32) {
    %c0_i32 = arith.constant 0 : i32
    %c0_i32_0 = arith.constant 0 : i32
    return %arg0, %c0_i32 : i32, i32
  }
  func.func @transform_1(%arg0: i32) -> (i32, i32) {
    %c0_i32 = arith.constant 0 : i32
    %c0_i32_0 = arith.constant 0 : i32
    %c0_i32_1 = arith.constant 0 : i32
    return %c0_i32, %c0_i32_0 : i32, i32
  }
  func.func @transform_2(%arg0: i32) -> (i32, i32) {
    %c0_i32 = arith.constant 0 : i32
    %c0_i32_0 = arith.constant 0 : i32
    %c0_i32_1 = arith.constant 0 : i32
    return %c0_i32, %c0_i32_0 : i32, i32
  }
  func.func @transform_3(%arg0: i32) -> (i32, i32) {
    %c0_i32 = arith.constant 0 : i32
    %c0_i32_0 = arith.constant 0 : i32
    %c0_i32_1 = arith.constant 0 : i32
    return %c0_i32, %c0_i32_0 : i32, i32
  }
  func.func @transform_4(%arg0: i32) -> (i32, i32) {
    %c0_i32 = arith.constant 0 : i32
    %c0_i32_0 = arith.constant 0 : i32
    %c0_i32_1 = arith.constant 0 : i32
    return %c0_i32, %c0_i32_0 : i32, i32
  }
  func.func @transform_5(%arg0: i32) -> (i32, i32) {
    %c0_i32 = arith.constant 0 : i32
    %c0_i32_0 = arith.constant 0 : i32
    %c0_i32_1 = arith.constant 0 : i32
    return %c0_i32, %c0_i32_0 : i32, i32
  }
  func.func @transform_6(%arg0: i32) -> (i32, i32) {
    %c0_i32 = arith.constant 0 : i32
    %c0_i32_0 = arith.constant 0 : i32
    %c0_i32_1 = arith.constant 0 : i32
    return %c0_i32, %c0_i32_0 : i32, i32
  }
  func.func @transform_7(%arg0: i32) -> (i32, i32) {
    %c0_i32 = arith.constant 0 : i32
    %c0_i32_0 = arith.constant 0 : i32
    return %arg0, %c0_i32 : i32, i32
  }
}

</mosaic_0001>

<bundles_post_ra>
// kernel: tpu_custom_call.1
= control target key start
LH: loop header
LB: loop body
LE: loop exit
PB: predicated region body
PF: predicated region fallthrough
CT: control target
= control target key end

     0   :  { %12 = vsyncpa [#allocation3], 0  ;;  %s5526_s0 = inlined_call_operand.hbm [shape: bf16[8,896], index: 0, kind: input, shape index: {}]   ;;  %s5527_s1 = inlined_call_operand.hbm [shape: bf16[896,512], index: 1, kind: input, shape index: {}]   ;;  %s5528_s2 = inlined_call_operand.hbm [shape: f32[1,512], index: 2, kind: input, shape index: {}]   ;;  %s5529_s3 = inlined_call_operand.hbm [shape: bf16[512,512], index: 3, kind: input, shape index: {}]   ;;  %s5530_s4 = inlined_call_operand.hbm [shape: f32[1,512], index: 4, kind: input, shape index: {}]   ;;  %s5531_s5 = inlined_call_operand.hbm [shape: bf16[512,128], index: 5, kind: input, shape index: {}]   ;;  %s5532_s6 = inlined_call_operand.vmem [shape: f32[1,128], index: 6, kind: input, shape index: {}]   ;;  %s5533_s7 = inlined_call_operand.hbm [shape: f32[8,128], index: 7, kind: output, shape index: {}]  }
   0x1   :  { %13 = vsyncpa [#allocation6], 0 }
   0x2   :  { %14 = vsyncpa [#allocation9], 0 }
   0x3   :  { %15 = vsyncpa [#allocation12], 0  ;;  %s32_s26 = sshll.u32 %s5527_s1, 4  ;;  %s33_s26 = int_to_ptr.hbm [resolvable:$true] %s32_s26 }
   0x4   :  { %16 = vsyncpa [#allocation4], 0  ;;  %s5308_s27 = smov [#allocation5]   ;;  %s56_s8 = sshll.u32 %s5529_s3, 4  ;;  %s57_s8 = int_to_ptr.hbm [resolvable:$true] %s56_s8 }
   0x5   :  { %s34_s28 = sshll.u32 %s5308_s27, 4  ;;  %s5309_s9 = smov 256   ;;  %s35_s28 = int_to_ptr.vmem [resolvable:$true] %s34_s28 }
   0x6   :  { %s5310_s10 = smov 16   ;;  %s5311_s11 = smov [#allocation8]  }
   0x7   :  { %40 = dma.hbm_to_vmem [thread:$0]  %s33_s26, 28672, %s35_s28, [#allocation6], %s5309_s9, %s5309_s9, %s5310_s10  }
   0x8   :  { %s58_s12 = sshll.u32 %s5311_s11, 4  ;;  %s22_s15 = sshll.u32 %s5526_s0, 4  ;;  %s59_s12 = int_to_ptr.vmem [resolvable:$true] %s58_s12  ;;  %s23_s15 = int_to_ptr.hbm [resolvable:$true] %s22_s15 }
   0x9   :  { %64 = dma.hbm_to_vmem [thread:$0]  %s57_s8, 16384, %s59_s12, [#allocation9], %s5309_s9, %s5309_s9, %s5310_s10  }
   0xa   :  { %s46_s17 = sshll.u32 %s5528_s2, 4  ;;  %s5312_s18 = smov [#allocation2]   ;;  %s47_s17 = int_to_ptr.hbm [resolvable:$true] %s46_s17 }
   0xb   :  { %s24_s19 = sshll.u32 %s5312_s18, 4  ;;  %s5313_s3 = smov [#allocation7]   ;;  %s25_s19 = int_to_ptr.vmem [resolvable:$true] %s24_s19 }
   0xc   :  { %27 = dma.hbm_to_vmem [thread:$0]  %s23_s15, 448, %s25_s19, [#allocation3]  }
   0xd   :  { %s48_s20 = sshll.u32 %s5313_s3, 4  ;;  %s70_s23 = sshll.u32 %s5530_s4, 4  ;;  %s49_s20 = int_to_ptr.vmem [resolvable:$true] %s48_s20  ;;  %s71_s23 = int_to_ptr.hbm [resolvable:$true] %s70_s23 }
   0xe   :  { %51 = dma.hbm_to_vmem [thread:$0]  %s47_s17, 64, %s49_s20, [#allocation6]  }
   0xf   :  { %s80_s25 = sshll.u32 %s5531_s5, 4  ;;  %s5314_s26 = smov [#allocation10]   ;;  %s81_s25 = int_to_ptr.hbm [resolvable:$true] %s80_s25 }
  0x10   :  { %s72_s2 = sshll.u32 %s5314_s26, 4  ;;  %s5315_s27 = smov [#allocation11]   ;;  %s73_s2 = int_to_ptr.vmem [resolvable:$true] %s72_s2 }
  0x11   :  { %75 = dma.hbm_to_vmem [thread:$0]  %s71_s23, 64, %s73_s2, [#allocation9]  }
  0x12   :  { %s82_s28 = sshll.u32 %s5315_s27, 4  ;;  %s5316_s29 = smov 64   ;;  %s83_s28 = int_to_ptr.vmem [resolvable:$true] %s82_s28 }
  0x13   :  { %s5317_s30 = smov 4  }
  0x14   :  { %88 = dma.hbm_to_vmem [thread:$0]  %s81_s25, 4096, %s83_s28, [#allocation12], %s5316_s29, %s5316_s29, %s5317_s30  }
  0x15   :  { %5298 = dma.done.wait [#allocation3], 448  }
  0x16   :  { %5299 = vsyncadd [#allocation3], 4294966848 }
  0x17   :  { %5300 = dma.done.wait [#allocation6], 28736  }
  0x18   :  { %5301 = vsyncadd [#allocation6], 4294938560 }
  0x19   :  { %5302 = dma.done.wait [#allocation9], 16448  }
  0x1a   :  { %5303 = vsyncadd [#allocation9], 4294950848 }
  0x1b   :  { %5304 = dma.done.wait [#allocation12], 4096  }
  0x1c   :  { %5305 = vsyncadd [#allocation12], 4294963200  ;;  %v3311_v0 = vld [vmem:[#allocation5 + $0xe0] sm:$0xf]  ;;  %v4763_v1 = vld [vmem:[#allocation5 + $0xec] sm:$0xf0] }
  0x1d   :  { %v3439_v2 = vld [vmem:[#allocation5 + $0x1e0] sm:$0xf]  ;;  %v3312_v3 = vor.u32 %v4763_v1, %v3311_v0  ;;  %v4795_v4 = vld [vmem:[#allocation5 + $0x1ec] sm:$0xf0]  ;;  %s5318_s8 = smov [#allocation13]   ;;  %s3184_s12 = sshll.u32 %s5533_s7, 4  ;;  %s3185_s12 = int_to_ptr.hbm [resolvable:$true] %s3184_s12 }
  0x1e   :  { %v3567_v5 = vld [vmem:[#allocation5 + $0x2e0] sm:$0xf]  ;;  %v4827_v6 = vld [vmem:[#allocation5 + $0x2ec] sm:$0xf0]  ;;  %v3440_v7 = vor.u32 %v4795_v4, %v3439_v2  ;;  %s3182_s9 = sshll.u32 %s5318_s8, 4  ;;  %s3183_s9 = int_to_ptr.vmem [resolvable:$true] %s3182_s9 }
  0x1f   :  { %v3568_v8 = vor.u32 %v4827_v6, %v3567_v5  ;;  %v3695_v9 = vld [vmem:[#allocation5 + $0x3e0] sm:$0xf]  ;;  %v4859_v10 = vld [vmem:[#allocation5 + $0x3ec] sm:$0xf0]  ;;  %1498 = vmatpush.bf16.msra.mxu0 %v3312_v3 }
  0x20   :  { %v3295_v11 = vld [vmem:[#allocation5 + $0xc0] sm:$0xf]  ;;  %v3696_v12 = vor.u32 %v4859_v10, %v3695_v9  ;;  %v4759_v13 = vld [vmem:[#allocation5 + $0xcc] sm:$0xf0]  ;;  %1511 = vmatpush.bf16.msra.mxu1 %v3440_v7 }
  0x21   :  { %v3423_v14 = vld [vmem:[#allocation5 + $0x1c0] sm:$0xf]  ;;  %v4791_v15 = vld [vmem:[#allocation5 + $0x1cc] sm:$0xf0]  ;;  %1524 = vmatpush.bf16.msra.mxu2 %v3568_v8  ;;  %v3296_v16 = vor.u32 %v4759_v13, %v3295_v11 }
  0x22   :  { %v3424_v17 = vor.u32 %v4791_v15, %v3423_v14  ;;  %v3551_v18 = vld [vmem:[#allocation5 + $0x2c0] sm:$0xf]  ;;  %v4823_v19 = vld [vmem:[#allocation5 + $0x2cc] sm:$0xf0]  ;;  %1537 = vmatpush.bf16.msra.mxu3 %v3696_v12 }
  0x23   :  { %v3679_v20 = vld [vmem:[#allocation5 + $0x3c0] sm:$0xf]  ;;  %v3552_v21 = vor.u32 %v4823_v19, %v3551_v18  ;;  %v4855_v22 = vld [vmem:[#allocation5 + $0x3cc] sm:$0xf0]  ;;  %1499 = vmatpush.bf16.msra.mxu0 %v3296_v16 }
  0x24   :  { %v3279_v23 = vld [vmem:[#allocation5 + $0xa0] sm:$0xf]  ;;  %v4755_v24 = vld [vmem:[#allocation5 + $0xac] sm:$0xf0]  ;;  %v3680_v25 = vor.u32 %v4855_v22, %v3679_v20  ;;  %1512 = vmatpush.bf16.msra.mxu1 %v3424_v17 }
  0x25   :  { %v3407_v26 = vld [vmem:[#allocation5 + $0x1a0] sm:$0xf]  ;;  %v4787_v27 = vld [vmem:[#allocation5 + $0x1ac] sm:$0xf0]  ;;  %v3280_v29 = vor.u32 %v4755_v24, %v3279_v23  ;;  %1525 = vmatpush.bf16.msra.mxu2 %v3552_v21 }
  0x26   :  { %v3535_v28 = vld [vmem:[#allocation5 + $0x2a0] sm:$0xf]  ;;  %v4819_v30 = vld [vmem:[#allocation5 + $0x2ac] sm:$0xf0]  ;;  %v3408_v33 = vor.u32 %v4787_v27, %v3407_v26  ;;  %1538 = vmatpush.bf16.msra.mxu3 %v3680_v25 }
  0x27   :  { %v3663_v31 = vld [vmem:[#allocation5 + $0x3a0] sm:$0xf]  ;;  %v4851_v32 = vld [vmem:[#allocation5 + $0x3ac] sm:$0xf0]  ;;  %v3536_v34 = vor.u32 %v4819_v30, %v3535_v28  ;;  %1500 = vmatpush.bf16.msra.mxu0 %v3280_v29 }
  0x28   :  { %v3263_v35 = vld [vmem:[#allocation5 + $0x80] sm:$0xf]  ;;  %v4751_v36 = vld [vmem:[#allocation5 + $0x8c] sm:$0xf0]  ;;  %v3664_v38 = vor.u32 %v4851_v32, %v3663_v31  ;;  %1513 = vmatpush.bf16.msra.mxu1 %v3408_v33 }
  0x29   :  { %v3391_v37 = vld [vmem:[#allocation5 + $0x180] sm:$0xf]  ;;  %v4783_v39 = vld [vmem:[#allocation5 + $0x18c] sm:$0xf0]  ;;  %v3264_v44 = vor.u32 %v4751_v36, %v3263_v35  ;;  %1526 = vmatpush.bf16.msra.mxu2 %v3536_v34 }
  0x2a   :  { %v3519_v40 = vld [vmem:[#allocation5 + $0x280] sm:$0xf]  ;;  %v4815_v41 = vld [vmem:[#allocation5 + $0x28c] sm:$0xf0]  ;;  %v3392_v45 = vor.u32 %v4783_v39, %v3391_v37  ;;  %1539 = vmatpush.bf16.msra.mxu3 %v3664_v38  ;;  %v4761_v37 = vld [vmem:[#allocation5 + $0xe4] sm:$0xf] }
  0x2b   :  { %v3647_v42 = vld [vmem:[#allocation5 + $0x380] sm:$0xf]  ;;  %v4847_v43 = vld [vmem:[#allocation5 + $0x38c] sm:$0xf0]  ;;  %v3520_v46 = vor.u32 %v4815_v41, %v3519_v40  ;;  %1501 = vmatpush.bf16.msra.mxu0 %v3264_v44  ;;  %v3313_v38 = vld [vmem:[#allocation5 + $0xf0] sm:$0xf0] }
  0x2c   :  { %v3247_v47 = vld [vmem:[#allocation5 + $0x60] sm:$0xf]  ;;  %v4747_v48 = vld [vmem:[#allocation5 + $0x6c] sm:$0xf0]  ;;  %v3648_v50 = vor.u32 %v4847_v43, %v3647_v42  ;;  %1514 = vmatpush.bf16.msra.mxu1 %v3392_v45 }
  0x2d   :  { %v3375_v49 = vld [vmem:[#allocation5 + $0x160] sm:$0xf]  ;;  %v4779_v51 = vld [vmem:[#allocation5 + $0x16c] sm:$0xf0]  ;;  %v3248_v56 = vor.u32 %v4747_v48, %v3247_v47  ;;  %1527 = vmatpush.bf16.msra.mxu2 %v3520_v46  ;;  %v3316_v46 = vor.u32 %v4761_v37, %v3313_v38 }
  0x2e   :  { %v3503_v52 = vld [vmem:[#allocation5 + $0x260] sm:$0xf]  ;;  %v4811_v53 = vld [vmem:[#allocation5 + $0x26c] sm:$0xf0]  ;;  %v3376_v57 = vor.u32 %v4779_v51, %v3375_v49  ;;  %1540 = vmatpush.bf16.msra.mxu3 %v3648_v50  ;;  %v4757_v50 = vld [vmem:[#allocation5 + $0xc4] sm:$0xf] }
  0x2f   :  { %v3631_v54 = vld [vmem:[#allocation5 + $0x360] sm:$0xf]  ;;  %v4843_v55 = vld [vmem:[#allocation5 + $0x36c] sm:$0xf0]  ;;  %v3504_v58 = vor.u32 %v4811_v53, %v3503_v52  ;;  %1502 = vmatpush.bf16.msra.mxu0 %v3248_v56  ;;  %v3297_v51 = vld [vmem:[#allocation5 + $0xd0] sm:$0xf0] }
  0x30   :  { %v3231_v59 = vld [vmem:[#allocation5 + $0x40] sm:$0xf]  ;;  %v4743_v60 = vld [vmem:[#allocation5 + $0x4c] sm:$0xf0]  ;;  %v3632_v62 = vor.u32 %v4843_v55, %v3631_v54  ;;  %1515 = vmatpush.bf16.msra.mxu1 %v3376_v57 }
  0x31   :  { %v3359_v61 = vld [vmem:[#allocation5 + $0x140] sm:$0xf]  ;;  %v4775_v63 = vld [vmem:[#allocation5 + $0x14c] sm:$0xf0]  ;;  %v3232_v4 = vor.u32 %v4743_v60, %v3231_v59  ;;  %1528 = vmatpush.bf16.msra.mxu2 %v3504_v58  ;;  %v3300_v59 = vor.u32 %v4757_v50, %v3297_v51 }
  0x32   :  { %v3487_v0 = vld [vmem:[#allocation5 + $0x240] sm:$0xf]  ;;  %v4807_v1 = vld [vmem:[#allocation5 + $0x24c] sm:$0xf0]  ;;  %v3360_v5 = vor.u32 %v4775_v63, %v3359_v61  ;;  %1541 = vmatpush.bf16.msra.mxu3 %v3632_v62  ;;  %v4753_v62 = vld [vmem:[#allocation5 + $0xa4] sm:$0xf] }
  0x33   :  { %v3615_v2 = vld [vmem:[#allocation5 + $0x340] sm:$0xf]  ;;  %v4839_v3 = vld [vmem:[#allocation5 + $0x34c] sm:$0xf0]  ;;  %v3488_v6 = vor.u32 %v4807_v1, %v3487_v0  ;;  %1503 = vmatpush.bf16.msra.mxu0 %v3232_v4  ;;  %v3281_v63 = vld [vmem:[#allocation5 + $0xb0] sm:$0xf0] }
  0x34   :  { %v3215_v7 = vld [vmem:[#allocation5 + $0x20] sm:$0xf]  ;;  %v4739_v8 = vld [vmem:[#allocation5 + $0x2c] sm:$0xf0]  ;;  %v3616_v10 = vor.u32 %v4839_v3, %v3615_v2  ;;  %1516 = vmatpush.bf16.msra.mxu1 %v3360_v5  ;;  %v115_v3 = vld [vmem:[#allocation2] sm:$0xff] }
  0x35   :  { %v3343_v9 = vld [vmem:[#allocation5 + $0x120] sm:$0xf]  ;;  %v4771_v11 = vld [vmem:[#allocation5 + $0x12c] sm:$0xf0]  ;;  %v3216_v16 = vor.u32 %v4739_v8, %v3215_v7  ;;  %1529 = vmatpush.bf16.msra.mxu2 %v3488_v6 }
  0x36   :  { %v3471_v12 = vld [vmem:[#allocation5 + $0x220] sm:$0xf]  ;;  %v4803_v13 = vld [vmem:[#allocation5 + $0x22c] sm:$0xf0]  ;;  %v3344_v19 = vor.u32 %v4771_v11, %v3343_v9  ;;  %1542 = vmatpush.bf16.msra.mxu3 %v3616_v10  ;;  %v357_v9 = vunpack.c.l.b16 %v115_v3  ;;  %v3284_v11 = vor.u32 %v4753_v62, %v3281_v63 }
  0x37   :  { %v3599_v14 = vld [vmem:[#allocation5 + $0x320] sm:$0xf]  ;;  %v4835_v15 = vld [vmem:[#allocation5 + $0x32c] sm:$0xf0]  ;;  %v3472_v20 = vor.u32 %v4803_v13, %v3471_v12  ;;  %1504 = vmatpush.bf16.msra.mxu0 %v3216_v16  ;;  %v4749_v16 = vld [vmem:[#allocation5 + $0x84] sm:$0xf] }
  0x38   :  { %v3199_v17 = vld [vmem:[#allocation5] sm:$0xf]  ;;  %v4735_v18 = vld [vmem:[#allocation5 + $0xc] sm:$0xf0]  ;;  %v3600_v24 = vor.u32 %v4835_v15, %v3599_v14  ;;  %1517 = vmatpush.bf16.msra.mxu1 %v3344_v19  ;;  %v358_v15 = vunpack.c.h.b16 %v115_v3  ;;  %v5379_v19 = vpack.c.b16 %v357_v9, %v357_v9  ;;  %v118_v3 = vld [vmem:[#allocation2 + $0x18] sm:$0xf] }
  0x39   :  { %v3327_v21 = vld [vmem:[#allocation5 + $0x100] sm:$0xf]  ;;  %v4767_v22 = vld [vmem:[#allocation5 + $0x10c] sm:$0xf0]  ;;  %v3200_v31 = vor.u32 %v4735_v18, %v3199_v17  ;;  %1530 = vmatpush.bf16.msra.mxu2 %v3472_v20  ;;  %v3265_v17 = vld [vmem:[#allocation5 + $0x90] sm:$0xf0] }
  0x3a   :  { %v3455_v23 = vld [vmem:[#allocation5 + $0x200] sm:$0xf]  ;;  %v4799_v25 = vld [vmem:[#allocation5 + $0x20c] sm:$0xf0]  ;;  %v3328_v35 = vor.u32 %v4767_v22, %v3327_v21  ;;  %1543 = vmatpush.bf16.msra.mxu3 %v3600_v24  ;;  %v5383_v22 = vpack.c.b16 %v358_v15, %v358_v15  ;;  %v3441_v9 = vld [vmem:[#allocation5 + $0x1f0] sm:$0xf0]  ;;  %v363_v15 = vunpack.c.l.b16 %v118_v3 }
  0x3b   :  { %v3583_v26 = vld [vmem:[#allocation5 + $0x300] sm:$0xf]  ;;  %v4831_v27 = vld [vmem:[#allocation5 + $0x30c] sm:$0xf0]  ;;  %v3456_v36 = vor.u32 %v4799_v25, %v3455_v23  ;;  %1505 = vmatpush.bf16.msra.mxu0 %v3200_v31 }
  0x3c   :  { %v3823_v28 = vld [vmem:[#allocation5 + $0x4e0] sm:$0xf]  ;;  %v4891_v29 = vld [vmem:[#allocation5 + $0x4ec] sm:$0xf0]  ;;  %v3584_v39 = vor.u32 %v4831_v27, %v3583_v26  ;;  %1518 = vmatpush.bf16.msra.mxu1 %v3328_v35 }
  0x3d   :  { %v3951_v30 = vld [vmem:[#allocation5 + $0x5e0] sm:$0xf]  ;;  %v4923_v32 = vld [vmem:[#allocation5 + $0x5ec] sm:$0xf0]  ;;  %v3824_v40 = vor.u32 %v4891_v29, %v3823_v28  ;;  %1531 = vmatpush.bf16.msra.mxu2 %v3456_v36  ;;  %v3268_v28 = vor.u32 %v4749_v16, %v3265_v17 }
  0x3e   :  { %v4079_v33 = vld [vmem:[#allocation5 + $0x6e0] sm:$0xf]  ;;  %v4955_v34 = vld [vmem:[#allocation5 + $0x6ec] sm:$0xf0]  ;;  %v3952_v41 = vor.u32 %v4923_v32, %v3951_v30  ;;  %1544 = vmatpush.bf16.msra.mxu3 %v3584_v39  ;;  %v4745_v32 = vld [vmem:[#allocation5 + $0x64] sm:$0xf]  ;;  %1506 = vmatmul.bf16.vlgmr.msra.gmra.mxu0 %v5379_v19 }
  0x3f   :  { %v4080_v42 = vor.u32 %v4955_v34, %v4079_v33  ;;  %v3807_v43 = vld [vmem:[#allocation5 + $0x4c0] sm:$0xf]  ;;  %v4887_v44 = vld [vmem:[#allocation5 + $0x4cc] sm:$0xf0]  ;;  %1550 = vmatpush.bf16.msrb.mxu0 %v3824_v40  ;;  %v3249_v33 = vld [vmem:[#allocation5 + $0x70] sm:$0xf0]  ;;  %1519 = vmatmul.bf16.vlgmr.msra.gmra.mxu1 %v5383_v22 }
  0x40   :  { %v3935_v45 = vld [vmem:[#allocation5 + $0x5c0] sm:$0xf]  ;;  %v4919_v47 = vld [vmem:[#allocation5 + $0x5cc] sm:$0xf0]  ;;  %v3808_v52 = vor.u32 %v4887_v44, %v3807_v43  ;;  %1563 = vmatpush.bf16.msrb.mxu1 %v3952_v41  ;;  %v3252_v40 = vor.u32 %v4745_v32, %v3249_v33  ;;  %v4741_v44 = vld [vmem:[#allocation5 + $0x44] sm:$0xf] }
  0x41   :  { %v4063_v48 = vld [vmem:[#allocation5 + $0x6c0] sm:$0xf]  ;;  %v4951_v49 = vld [vmem:[#allocation5 + $0x6cc] sm:$0xf0]  ;;  %1576 = vmatpush.bf16.msrb.mxu2 %v4080_v42  ;;  %v3936_v54 = vor.u32 %v4919_v47, %v3935_v45  ;;  %v3233_v45 = vld [vmem:[#allocation5 + $0x50] sm:$0xf0] }
  0x42   :  { %v3791_v53 = vld [vmem:[#allocation5 + $0x4a0] sm:$0xf]  ;;  %v4064_v55 = vor.u32 %v4951_v49, %v4063_v48  ;;  %v4883_v56 = vld [vmem:[#allocation5 + $0x4ac] sm:$0xf0]  ;;  %1589 = vmatpush.bf16.msrb.mxu3 %v3316_v46  ;;  %v4821_v32 = vld [vmem:[#allocation5 + $0x2c4] sm:$0xf] }
  0x43   :  { %v3919_v57 = vld [vmem:[#allocation5 + $0x5a0] sm:$0xf]  ;;  %v4915_v58 = vld [vmem:[#allocation5 + $0x5ac] sm:$0xf0]  ;;  %1551 = vmatpush.bf16.msrb.mxu0 %v3808_v52  ;;  %v3792_v0 = vor.u32 %v4883_v56, %v3791_v53  ;;  %v3236_v52 = vor.u32 %v4741_v44, %v3233_v45  ;;  %v4737_v56 = vld [vmem:[#allocation5 + $0x24] sm:$0xf] }
  0x44   :  { %v4047_v60 = vld [vmem:[#allocation5 + $0x6a0] sm:$0xf]  ;;  %v4947_v61 = vld [vmem:[#allocation5 + $0x6ac] sm:$0xf0]  ;;  %v3920_v1 = vor.u32 %v4915_v58, %v3919_v57  ;;  %1564 = vmatpush.bf16.msrb.mxu1 %v3936_v54  ;;  %v3217_v57 = vld [vmem:[#allocation5 + $0x30] sm:$0xf0] }
  0x45   :  { %v116_v2 = vld [vmem:[#allocation2 + $0x8] sm:$0xff]  ;;  %1577 = vmatpush.bf16.msrb.mxu2 %v4064_v55  ;;  %v4048_v4 = vor.u32 %v4947_v61, %v4047_v60  ;;  %v3775_v5 = vld [vmem:[#allocation5 + $0x480] sm:$0xf]  ;;  %v4785_v45 = vld [vmem:[#allocation5 + $0x1a4] sm:$0xf] }
  0x46   :  { %v4879_v6 = vld [vmem:[#allocation5 + $0x48c] sm:$0xf0]  ;;  %v3903_v7 = vld [vmem:[#allocation5 + $0x580] sm:$0xf]  ;;  %v359_v8 = vunpack.c.l.b16 %v116_v2  ;;  %v360_v10 = vunpack.c.h.b16 %v116_v2  ;;  %1590 = vmatpush.bf16.msrb.mxu3 %v3300_v59 }
  0x47   :  { %v4911_v12 = vld [vmem:[#allocation5 + $0x58c] sm:$0xf0]  ;;  %v4031_v13 = vld [vmem:[#allocation5 + $0x680] sm:$0xf]  ;;  %1552 = vmatpush.bf16.msrb.mxu0 %v3792_v0  ;;  %v3776_v21 = vor.u32 %v4879_v6, %v3775_v5  ;;  %v4733_v5 = vld [vmem:[#allocation5 + $0x4] sm:$0xf] }
  0x48   :  { %v4943_v14 = vld [vmem:[#allocation5 + $0x68c] sm:$0xf0]  ;;  %v5377_v18 = vpack.c.b16 %v359_v8, %v359_v8  ;;  %v5381_v20 = vpack.c.b16 %v360_v10, %v360_v10  ;;  %1565 = vmatpush.bf16.msrb.mxu1 %v3920_v1  ;;  %v3904_v23 = vor.u32 %v4911_v12, %v3903_v7  ;;  %v3759_v25 = vld [vmem:[#allocation5 + $0x460] sm:$0xf]  ;;  %v3201_v6 = vld [vmem:[#allocation5 + $0x10] sm:$0xf0] }
  0x49   :  { %1578 = vmatpush.bf16.msrb.mxu2 %v4048_v4  ;;  %v4032_v24 = vor.u32 %v4943_v14, %v4031_v13  ;;  %v4875_v26 = vld [vmem:[#allocation5 + $0x46c] sm:$0xf0]  ;;  %v3887_v27 = vld [vmem:[#allocation5 + $0x560] sm:$0xf]  ;;  %v3220_v4 = vor.u32 %v4737_v56, %v3217_v57  ;;  %v117_v7 = vld [vmem:[#allocation2 + $0x10] sm:$0xff] }
  0x4a   :  { %1591 = vmatpush.bf16.msrb.mxu3 %v3284_v11  ;;  %v4907_v29 = vld [vmem:[#allocation5 + $0x56c] sm:$0xf0]  ;;  %v4015_v30 = vld [vmem:[#allocation5 + $0x660] sm:$0xf]  ;;  %1532 = vmatmul.bf16.vlgmr.msra.gmra.mxu2 %v5377_v18  ;;  %v3760_v34 = vor.u32 %v4875_v26, %v3759_v25  ;;  %v4793_v8 = vld [vmem:[#allocation5 + $0x1e4] sm:$0xf]  ;;  %v362_v25 = vunpack.c.h.b16 %v117_v7  ;;  %v3204_v26 = vor.u32 %v4733_v5, %v3201_v6 }
  0x4b   :  { %v4939_v31 = vld [vmem:[#allocation5 + $0x66c] sm:$0xf0]  ;;  %1545 = vmatmul.bf16.vlgmr.msra.gmra.mxu3 %v5381_v20  ;;  %1553 = vmatpush.bf16.msrb.mxu0 %v3776_v21  ;;  %v3888_v35 = vor.u32 %v4907_v29, %v3887_v27  ;;  %v3743_v37 = vld [vmem:[#allocation5 + $0x440] sm:$0xf]  ;;  %v4825_v10 = vld [vmem:[#allocation5 + $0x2e4] sm:$0xf]  ;;  %v3444_v27 = vor.u32 %v4793_v8, %v3441_v9 }
  0x4c   :  { %1566 = vmatpush.bf16.msrb.mxu1 %v3904_v23  ;;  %v4016_v36 = vor.u32 %v4939_v31, %v4015_v30  ;;  %v4871_v38 = vld [vmem:[#allocation5 + $0x44c] sm:$0xf0]  ;;  %v3871_v39 = vld [vmem:[#allocation5 + $0x540] sm:$0xf]  ;;  %v3569_v12 = vld [vmem:[#allocation5 + $0x2f0] sm:$0xf0] }
  0x4d   :  { %1579 = vmatpush.bf16.msrb.mxu2 %v4032_v24  ;;  %v4903_v41 = vld [vmem:[#allocation5 + $0x54c] sm:$0xf0]  ;;  %v3999_v42 = vld [vmem:[#allocation5 + $0x640] sm:$0xf]  ;;  %v3744_v46 = vor.u32 %v4871_v38, %v3743_v37  ;;  %v4857_v13 = vld [vmem:[#allocation5 + $0x3e4] sm:$0xf]  ;;  %v361_v24 = vunpack.c.l.b16 %v117_v7  ;;  %v5389_v37 = vpack.c.b16 %v363_v15, %v363_v15 }
  0x4e   :  { %1592 = vmatpush.bf16.msrb.mxu3 %v3268_v28  ;;  %v4935_v43 = vld [vmem:[#allocation5 + $0x64c] sm:$0xf0]  ;;  %v3872_v47 = vor.u32 %v4903_v41, %v3871_v39  ;;  %v3727_v49 = vld [vmem:[#allocation5 + $0x420] sm:$0xf]  ;;  %v3697_v14 = vld [vmem:[#allocation5 + $0x3f0] sm:$0xf0]  ;;  %v3572_v28 = vor.u32 %v4825_v10, %v3569_v12  ;;  %v5393_v41 = vpack.c.b16 %v362_v25, %v362_v25 }
  0x4f   :  { %1554 = vmatpush.bf16.msrb.mxu0 %v3760_v34  ;;  %v4000_v48 = vor.u32 %v4935_v43, %v3999_v42  ;;  %v4867_v50 = vld [vmem:[#allocation5 + $0x42c] sm:$0xf0]  ;;  %v3855_v51 = vld [vmem:[#allocation5 + $0x520] sm:$0xf]  ;;  %v4889_v21 = vld [vmem:[#allocation5 + $0x4e4] sm:$0xf]  ;;  %v3700_v29 = vor.u32 %v4857_v13, %v3697_v14 }
  0x50   :  { %1567 = vmatpush.bf16.msrb.mxu1 %v3888_v35  ;;  %v4899_v53 = vld [vmem:[#allocation5 + $0x52c] sm:$0xf0]  ;;  %v3983_v54 = vld [vmem:[#allocation5 + $0x620] sm:$0xf]  ;;  %v3728_v59 = vor.u32 %v4867_v50, %v3727_v49  ;;  %v3825_v23 = vld [vmem:[#allocation5 + $0x4f0] sm:$0xf0] }
  0x51   :  { %1580 = vmatpush.bf16.msrb.mxu2 %v4016_v36  ;;  %v4931_v55 = vld [vmem:[#allocation5 + $0x62c] sm:$0xf0]  ;;  %v3711_v58 = vld [vmem:[#allocation5 + $0x400] sm:$0xf]  ;;  %v3856_v63 = vor.u32 %v4899_v53, %v3855_v51  ;;  %v4789_v30 = vld [vmem:[#allocation5 + $0x1c4] sm:$0xf]  ;;  %v3828_v33 = vor.u32 %v4889_v21, %v3825_v23 }
  0x52   :  { %1593 = vmatpush.bf16.msrb.mxu3 %v3252_v40  ;;  %v4863_v60 = vld [vmem:[#allocation5 + $0x40c] sm:$0xf0]  ;;  %v3839_v61 = vld [vmem:[#allocation5 + $0x500] sm:$0xf]  ;;  %v3984_v0 = vor.u32 %v4931_v55, %v3983_v54  ;;  %v3425_v31 = vld [vmem:[#allocation5 + $0x1d0] sm:$0xf0]  ;;  %v5391_v40 = vpack.c.b16 %v361_v24, %v361_v24 }
  0x53   :  { %1555 = vmatpush.bf16.msrb.mxu0 %v3744_v46  ;;  %v4895_v62 = vld [vmem:[#allocation5 + $0x50c] sm:$0xf0]  ;;  %v3967_v1 = vld [vmem:[#allocation5 + $0x600] sm:$0xf]  ;;  %v3712_v11 = vor.u32 %v4863_v60, %v3711_v58  ;;  %v3553_v34 = vld [vmem:[#allocation5 + $0x2d0] sm:$0xf0]  ;;  %v3428_v42 = vor.u32 %v4789_v30, %v3425_v31 }
  0x54   :  { %1568 = vmatpush.bf16.msrb.mxu1 %v3872_v47  ;;  %v4927_v2 = vld [vmem:[#allocation5 + $0x60c] sm:$0xf0]  ;;  %v3840_v16 = vor.u32 %v4895_v62, %v3839_v61  ;;  %v4853_v35 = vld [vmem:[#allocation5 + $0x3c4] sm:$0xf]  ;;  %v3681_v36 = vld [vmem:[#allocation5 + $0x3d0] sm:$0xf0]  ;;  %v3556_v43 = vor.u32 %v4821_v32, %v3553_v34 }
  0x55   :  { %1581 = vmatpush.bf16.msrb.mxu2 %v4000_v48  ;;  %v3968_v17 = vor.u32 %v4927_v2, %v3967_v1  ;;  %v4885_v38 = vld [vmem:[#allocation5 + $0x4c4] sm:$0xf]  ;;  %v3809_v39 = vld [vmem:[#allocation5 + $0x4d0] sm:$0xf0]  ;;  %v3684_v44 = vor.u32 %v4853_v35, %v3681_v36 }
  0x56   :  { %1594 = vmatpush.bf16.msrb.mxu3 %v3236_v52  ;;  %v3409_v46 = vld [vmem:[#allocation5 + $0x1b0] sm:$0xf0]  ;;  %v4817_v47 = vld [vmem:[#allocation5 + $0x2a4] sm:$0xf]  ;;  %v3812_v48 = vor.u32 %v4885_v38, %v3809_v39 }
  0x57   :  { %1556 = vmatpush.bf16.msrb.mxu0 %v3728_v59  ;;  %v3537_v49 = vld [vmem:[#allocation5 + $0x2b0] sm:$0xf0]  ;;  %v4849_v50 = vld [vmem:[#allocation5 + $0x3a4] sm:$0xf]  ;;  %v3412_v54 = vor.u32 %v4785_v45, %v3409_v46 }
  0x58   :  { %1569 = vmatpush.bf16.msrb.mxu1 %v3856_v63  ;;  %v3665_v51 = vld [vmem:[#allocation5 + $0x3b0] sm:$0xf0]  ;;  %v4881_v52 = vld [vmem:[#allocation5 + $0x4a4] sm:$0xf]  ;;  %v3540_v55 = vor.u32 %v4817_v47, %v3537_v49 }
  0x59   :  { %1582 = vmatpush.bf16.msrb.mxu2 %v3984_v0  ;;  %v3793_v53 = vld [vmem:[#allocation5 + $0x4b0] sm:$0xf0]  ;;  %v3668_v56 = vor.u32 %v4849_v50, %v3665_v51  ;;  %v4781_v57 = vld [vmem:[#allocation5 + $0x184] sm:$0xf] }
  0x5a   :  { %1595 = vmatpush.bf16.msrb.mxu3 %v3220_v4  ;;  %v3393_v58 = vld [vmem:[#allocation5 + $0x190] sm:$0xf0]  ;;  %v4813_v59 = vld [vmem:[#allocation5 + $0x284] sm:$0xf]  ;;  %v3796_v60 = vor.u32 %v4881_v52, %v3793_v53 }
  0x5b   :  { %1557 = vmatpush.bf16.msrb.mxu0 %v3712_v11  ;;  %v3521_v61 = vld [vmem:[#allocation5 + $0x290] sm:$0xf0]  ;;  %v4845_v62 = vld [vmem:[#allocation5 + $0x384] sm:$0xf]  ;;  %v3396_v2 = vor.u32 %v4781_v57, %v3393_v58 }
  0x5c   :  { %1570 = vmatpush.bf16.msrb.mxu1 %v3840_v16  ;;  %v3649_v63 = vld [vmem:[#allocation5 + $0x390] sm:$0xf0]  ;;  %v4877_v0 = vld [vmem:[#allocation5 + $0x484] sm:$0xf]  ;;  %v3524_v3 = vor.u32 %v4813_v59, %v3521_v61 }
  0x5d   :  { %1583 = vmatpush.bf16.msrb.mxu2 %v3968_v17  ;;  %v3777_v1 = vld [vmem:[#allocation5 + $0x490] sm:$0xf0]  ;;  %v3652_v4 = vor.u32 %v4845_v62, %v3649_v63  ;;  %v4777_v5 = vld [vmem:[#allocation5 + $0x164] sm:$0xf]  ;;  %v3319_v62 = vld [vmem:[#allocation5 + $0xe8] sm:$0xf] }
  0x5e   :  { %1596 = vmatpush.bf16.msrb.mxu3 %v3204_v26  ;;  %1558 = vmatmul.bf16.vlgmr.msrb.gmra.mxu0 %v5391_v40  ;;  %v3377_v6 = vld [vmem:[#allocation5 + $0x170] sm:$0xf0]  ;;  %v4809_v7 = vld [vmem:[#allocation5 + $0x264] sm:$0xf]  ;;  %v3780_v8 = vor.u32 %v4877_v0, %v3777_v1  ;;  %v4764_v63 = vld [vmem:[#allocation5 + $0xf4] sm:$0xf0] }
  0x5f   :  { %1602 = vmatpush.bf16.msra.mxu0 %v3444_v27  ;;  %1571 = vmatmul.bf16.vlgmr.msrb.gmra.mxu1 %v5393_v41  ;;  %v3505_v9 = vld [vmem:[#allocation5 + $0x270] sm:$0xf0]  ;;  %v4841_v10 = vld [vmem:[#allocation5 + $0x364] sm:$0xf]  ;;  %v3380_v14 = vor.u32 %v4777_v5, %v3377_v6 }
  0x60   :  { %1615 = vmatpush.bf16.msra.mxu1 %v3572_v28  ;;  %1584 = vmatmul.bf16.vlgmr.msrb.gmra.mxu2 %v5389_v37  ;;  %v3633_v11 = vld [vmem:[#allocation5 + $0x370] sm:$0xf0]  ;;  %v4873_v12 = vld [vmem:[#allocation5 + $0x464] sm:$0xf]  ;;  %v3508_v15 = vor.u32 %v4809_v7, %v3505_v9  ;;  %v3320_v7 = vor.u32 %v4764_v63, %v3319_v62 }
  0x61   :  { %1628 = vmatpush.bf16.msra.mxu2 %v3700_v29  ;;  %1597 = vmatmul.bf16.vlgmr.msrb.gmra.mxu3 %v5379_v19  ;;  %v3761_v13 = vld [vmem:[#allocation5 + $0x470] sm:$0xf0]  ;;  %v3636_v16 = vor.u32 %v4841_v10, %v3633_v11  ;;  %v4773_v17 = vld [vmem:[#allocation5 + $0x144] sm:$0xf] }
  0x62   :  { %1641 = vmatpush.bf16.msra.mxu3 %v3828_v33  ;;  %v3361_v21 = vld [vmem:[#allocation5 + $0x150] sm:$0xf0]  ;;  %v4805_v23 = vld [vmem:[#allocation5 + $0x244] sm:$0xf]  ;;  %v3764_v24 = vor.u32 %v4873_v12, %v3761_v13  ;;  %v3303_v13 = vld [vmem:[#allocation5 + $0xc8] sm:$0xf] }
  0x63   :  { %1603 = vmatpush.bf16.msra.mxu0 %v3428_v42  ;;  %v3489_v25 = vld [vmem:[#allocation5 + $0x250] sm:$0xf0]  ;;  %v4837_v26 = vld [vmem:[#allocation5 + $0x344] sm:$0xf]  ;;  %v3364_v30 = vor.u32 %v4773_v17, %v3361_v21 }
  0x64   :  { %1616 = vmatpush.bf16.msra.mxu1 %v3556_v43  ;;  %v3617_v27 = vld [vmem:[#allocation5 + $0x350] sm:$0xf0]  ;;  %v4869_v28 = vld [vmem:[#allocation5 + $0x444] sm:$0xf]  ;;  %v3492_v31 = vor.u32 %v4805_v23, %v3489_v25 }
  0x65   :  { %1629 = vmatpush.bf16.msra.mxu2 %v3684_v44  ;;  %v3745_v29 = vld [vmem:[#allocation5 + $0x450] sm:$0xf0]  ;;  %v3620_v32 = vor.u32 %v4837_v26, %v3617_v27  ;;  %v4769_v33 = vld [vmem:[#allocation5 + $0x124] sm:$0xf] }
  0x66   :  { %1642 = vmatpush.bf16.msra.mxu3 %v3812_v48  ;;  %v3345_v34 = vld [vmem:[#allocation5 + $0x130] sm:$0xf0]  ;;  %v4801_v35 = vld [vmem:[#allocation5 + $0x224] sm:$0xf]  ;;  %v3748_v36 = vor.u32 %v4869_v28, %v3745_v29  ;;  %v3287_v29 = vld [vmem:[#allocation5 + $0xa8] sm:$0xf] }
  0x67   :  { %1604 = vmatpush.bf16.msra.mxu0 %v3412_v54  ;;  %v3473_v38 = vld [vmem:[#allocation5 + $0x230] sm:$0xf0]  ;;  %v4833_v39 = vld [vmem:[#allocation5 + $0x324] sm:$0xf]  ;;  %v3348_v45 = vor.u32 %v4769_v33, %v3345_v34 }
  0x68   :  { %1617 = vmatpush.bf16.msra.mxu1 %v3540_v55  ;;  %v3601_v42 = vld [vmem:[#allocation5 + $0x330] sm:$0xf0]  ;;  %v4865_v43 = vld [vmem:[#allocation5 + $0x424] sm:$0xf]  ;;  %v3476_v48 = vor.u32 %v4801_v35, %v3473_v38 }
  0x69   :  { %1630 = vmatpush.bf16.msra.mxu2 %v3668_v56  ;;  %v3729_v44 = vld [vmem:[#allocation5 + $0x430] sm:$0xf0]  ;;  %v4765_v46 = vld [vmem:[#allocation5 + $0x104] sm:$0xf]  ;;  %v3604_v49 = vor.u32 %v4833_v39, %v3601_v42 }
  0x6a   :  { %1643 = vmatpush.bf16.msra.mxu3 %v3796_v60  ;;  %v3329_v47 = vld [vmem:[#allocation5 + $0x110] sm:$0xf0]  ;;  %v4797_v50 = vld [vmem:[#allocation5 + $0x204] sm:$0xf]  ;;  %v3732_v53 = vor.u32 %v4865_v43, %v3729_v44  ;;  %v3271_v44 = vld [vmem:[#allocation5 + $0x88] sm:$0xf] }
  0x6b   :  { %1605 = vmatpush.bf16.msra.mxu0 %v3396_v2  ;;  %v3457_v51 = vld [vmem:[#allocation5 + $0x210] sm:$0xf0]  ;;  %v4829_v52 = vld [vmem:[#allocation5 + $0x304] sm:$0xf]  ;;  %v3332_v60 = vor.u32 %v4765_v46, %v3329_v47  ;;  %v3447_v2 = vld [vmem:[#allocation5 + $0x1e8] sm:$0xf] }
  0x6c   :  { %1618 = vmatpush.bf16.msra.mxu1 %v3524_v3  ;;  %v3585_v54 = vld [vmem:[#allocation5 + $0x310] sm:$0xf0]  ;;  %v4861_v55 = vld [vmem:[#allocation5 + $0x404] sm:$0xf]  ;;  %v3460_v0 = vor.u32 %v4797_v50, %v3457_v51  ;;  %v4796_v3 = vld [vmem:[#allocation5 + $0x1f4] sm:$0xf0] }
  0x6d   :  { %1631 = vmatpush.bf16.msra.mxu2 %v3652_v4  ;;  %v3713_v56 = vld [vmem:[#allocation5 + $0x410] sm:$0xf0]  ;;  %v4921_v57 = vld [vmem:[#allocation5 + $0x5e4] sm:$0xf]  ;;  %v3588_v1 = vor.u32 %v4829_v52, %v3585_v54  ;;  %v3448_v11 = vor.u32 %v4796_v3, %v3447_v2  ;;  %v3399_v46 = vld [vmem:[#allocation5 + $0x188] sm:$0xf] }
  0x6e   :  { %1644 = vmatpush.bf16.msra.mxu3 %v3780_v8  ;;  %v3953_v58 = vld [vmem:[#allocation5 + $0x5f0] sm:$0xf0]  ;;  %v4953_v59 = vld [vmem:[#allocation5 + $0x6e4] sm:$0xf]  ;;  %v3716_v4 = vor.u32 %v4861_v55, %v3713_v56  ;;  %v4784_v47 = vld [vmem:[#allocation5 + $0x194] sm:$0xf0] }
  0x6f   :  { %1606 = vmatpush.bf16.msra.mxu0 %v3380_v14  ;;  %v4081_v61 = vld [vmem:[#allocation5 + $0x6f0] sm:$0xf0]  ;;  %v3956_v5 = vor.u32 %v4921_v57, %v3953_v58  ;;  %v4917_v8 = vld [vmem:[#allocation5 + $0x5c4] sm:$0xf]  ;;  %v4760_v14 = vld [vmem:[#allocation5 + $0xd4] sm:$0xf0]  ;;  %v3400_v54 = vor.u32 %v4784_v47, %v3399_v46 }
  0x70   :  { %1619 = vmatpush.bf16.msra.mxu1 %v3508_v15  ;;  %v4084_v6 = vor.u32 %v4953_v59, %v4081_v61  ;;  %v3937_v9 = vld [vmem:[#allocation5 + $0x5d0] sm:$0xf0]  ;;  %v4949_v10 = vld [vmem:[#allocation5 + $0x6c4] sm:$0xf]  ;;  %v3431_v15 = vld [vmem:[#allocation5 + $0x1c8] sm:$0xf]  ;;  %v3304_v23 = vor.u32 %v4760_v14, %v3303_v13 }
  0x71   :  { %1632 = vmatpush.bf16.msra.mxu2 %v3636_v16  ;;  %v4065_v12 = vld [vmem:[#allocation5 + $0x6d0] sm:$0xf0]  ;;  %v4792_v16 = vld [vmem:[#allocation5 + $0x1d4] sm:$0xf0]  ;;  %v3940_v17 = vor.u32 %v4917_v8, %v3937_v9  ;;  %v4945_v26 = vld [vmem:[#allocation5 + $0x6a4] sm:$0xf] }
  0x72   :  { %1645 = vmatpush.bf16.msra.mxu3 %v3764_v24  ;;  %v4068_v21 = vor.u32 %v4949_v10, %v4065_v12  ;;  %v4913_v24 = vld [vmem:[#allocation5 + $0x5a4] sm:$0xf]  ;;  %v3921_v25 = vld [vmem:[#allocation5 + $0x5b0] sm:$0xf0]  ;;  %v3432_v27 = vor.u32 %v4792_v16, %v3431_v15  ;;  %v3255_v56 = vld [vmem:[#allocation5 + $0x68] sm:$0xf] }
  0x73   :  { %1607 = vmatpush.bf16.msra.mxu0 %v3364_v30  ;;  %v4049_v28 = vld [vmem:[#allocation5 + $0x6b0] sm:$0xf0]  ;;  %v4756_v30 = vld [vmem:[#allocation5 + $0xb4] sm:$0xf0]  ;;  %v3924_v33 = vor.u32 %v4913_v24, %v3921_v25  ;;  %v4941_v39 = vld [vmem:[#allocation5 + $0x684] sm:$0xf] }
  0x74   :  { %1620 = vmatpush.bf16.msra.mxu1 %v3492_v31  ;;  %v3415_v31 = vld [vmem:[#allocation5 + $0x1a8] sm:$0xf]  ;;  %v4052_v34 = vor.u32 %v4945_v26, %v4049_v28  ;;  %v3288_v35 = vor.u32 %v4756_v30, %v3287_v29  ;;  %v3905_v38 = vld [vmem:[#allocation5 + $0x590] sm:$0xf0]  ;;  %v4905_v51 = vld [vmem:[#allocation5 + $0x564] sm:$0xf] }
  0x75   :  { %1633 = vmatpush.bf16.msra.mxu2 %v3620_v32  ;;  %v4788_v32 = vld [vmem:[#allocation5 + $0x1b4] sm:$0xf0]  ;;  %v4033_v43 = vld [vmem:[#allocation5 + $0x690] sm:$0xf0]  ;;  %v3383_v58 = vld [vmem:[#allocation5 + $0x168] sm:$0xf] }
  0x76   :  { %1646 = vmatpush.bf16.msra.mxu3 %v3748_v36  ;;  %v4909_v36 = vld [vmem:[#allocation5 + $0x584] sm:$0xf]  ;;  %v3416_v42 = vor.u32 %v4788_v32, %v3415_v31  ;;  %v3889_v52 = vld [vmem:[#allocation5 + $0x570] sm:$0xf0]  ;;  %v4748_v57 = vld [vmem:[#allocation5 + $0x74] sm:$0xf0] }
  0x77   :  { %1608 = vmatpush.bf16.msra.mxu0 %v3348_v45  ;;  %v4752_v45 = vld [vmem:[#allocation5 + $0x94] sm:$0xf0]  ;;  %v4017_v55 = vld [vmem:[#allocation5 + $0x670] sm:$0xf0]  ;;  %v3256_v62 = vor.u32 %v4748_v57, %v3255_v56  ;;  %v4901_v63 = vld [vmem:[#allocation5 + $0x544] sm:$0xf] }
  0x78   :  { %1621 = vmatpush.bf16.msra.mxu1 %v3476_v48  ;;  %v3908_v48 = vor.u32 %v4909_v36, %v3905_v38  ;;  %v3272_v50 = vor.u32 %v4752_v45, %v3271_v44  ;;  %v4780_v59 = vld [vmem:[#allocation5 + $0x174] sm:$0xf0]  ;;  %v4001_v3 = vld [vmem:[#allocation5 + $0x650] sm:$0xf0]  ;;  %v4929_v13 = vld [vmem:[#allocation5 + $0x624] sm:$0xf] }
  0x79   :  { %1634 = vmatpush.bf16.msra.mxu2 %v3604_v49  ;;  %v4036_v49 = vor.u32 %v4941_v39, %v4033_v43  ;;  %v3384_v2 = vor.u32 %v4780_v59, %v3383_v58  ;;  %v3857_v12 = vld [vmem:[#allocation5 + $0x530] sm:$0xf0]  ;;  %v3223_v16 = vld [vmem:[#allocation5 + $0x28] sm:$0xf]  ;;  %v4893_v25 = vld [vmem:[#allocation5 + $0x504] sm:$0xf] }
  0x7a   :  { %1647 = vmatpush.bf16.msra.mxu3 %v3732_v53  ;;  %v4937_v53 = vld [vmem:[#allocation5 + $0x664] sm:$0xf]  ;;  %v3985_v15 = vld [vmem:[#allocation5 + $0x630] sm:$0xf0]  ;;  %v3207_v31 = vld [vmem:[#allocation5 + $0x8] sm:$0xf] }
  0x7b   :  { %1609 = vmatpush.bf16.msra.mxu0 %v3332_v60  ;;  %v3892_v60 = vor.u32 %v4905_v51, %v3889_v52  ;;  %v4020_v61 = vor.u32 %v4937_v53, %v4017_v55  ;;  %v3841_v26 = vld [vmem:[#allocation5 + $0x510] sm:$0xf0]  ;;  %v4925_v29 = vld [vmem:[#allocation5 + $0x604] sm:$0xf]  ;;  %v3575_v36 = vld [vmem:[#allocation5 + $0x2e8] sm:$0xf] }
  0x7c   :  { %1622 = vmatpush.bf16.msra.mxu1 %v3460_v0  ;;  %v3873_v0 = vld [vmem:[#allocation5 + $0x550] sm:$0xf0]  ;;  %v4828_v38 = vld [vmem:[#allocation5 + $0x2f4] sm:$0xf0]  ;;  %v3703_v39 = vld [vmem:[#allocation5 + $0x3e8] sm:$0xf] }
  0x7d   :  { %1635 = vmatpush.bf16.msra.mxu2 %v3588_v1  ;;  %v4933_v1 = vld [vmem:[#allocation5 + $0x644] sm:$0xf]  ;;  %v3876_v8 = vor.u32 %v4901_v63, %v3873_v0  ;;  %v3969_v30 = vld [vmem:[#allocation5 + $0x610] sm:$0xf0]  ;;  %v4860_v43 = vld [vmem:[#allocation5 + $0x3f4] sm:$0xf0]  ;;  %v3576_v51 = vor.u32 %v4828_v38, %v3575_v36 }
  0x7e   :  { %1648 = vmatpush.bf16.msra.mxu3 %v3716_v4  ;;  %1610 = vmatmul.bf16.vlgmr.msra.gmra.mxu0 %v5383_v22  ;;  %v3239_v4 = vld [vmem:[#allocation5 + $0x48] sm:$0xf]  ;;  %v4004_v9 = vor.u32 %v4933_v1, %v4001_v3  ;;  %v4892_v45 = vld [vmem:[#allocation5 + $0x4f4] sm:$0xf0]  ;;  %v3972_v46 = vor.u32 %v4925_v29, %v3969_v30  ;;  %v3704_v52 = vor.u32 %v4860_v43, %v3703_v39 }
  0x7f   :  { %1654 = vmatpush.bf16.msrb.mxu0 %v3956_v5  ;;  %1623 = vmatmul.bf16.vlgmr.msra.gmra.mxu1 %v5377_v18  ;;  %v4744_v5 = vld [vmem:[#allocation5 + $0x54] sm:$0xf0]  ;;  %v3831_v44 = vld [vmem:[#allocation5 + $0x4e8] sm:$0xf] }
  0x80   :  { %1667 = vmatpush.bf16.msrb.mxu1 %v4084_v6  ;;  %1636 = vmatmul.bf16.vlgmr.msra.gmra.mxu2 %v5381_v20  ;;  %v3367_v6 = vld [vmem:[#allocation5 + $0x148] sm:$0xf]  ;;  %v3240_v10 = vor.u32 %v4744_v5, %v3239_v4  ;;  %v3832_v53 = vor.u32 %v4892_v45, %v3831_v44  ;;  %v4824_v55 = vld [vmem:[#allocation5 + $0x2d4] sm:$0xf0] }
  0x81   :  { %1680 = vmatpush.bf16.msrb.mxu2 %v3320_v7  ;;  %1649 = vmatmul.bf16.vlgmr.msra.gmra.mxu3 %v5391_v40  ;;  %v4776_v7 = vld [vmem:[#allocation5 + $0x154] sm:$0xf0]  ;;  %v3687_v56 = vld [vmem:[#allocation5 + $0x3c8] sm:$0xf] }
  0x82   :  { %1693 = vmatpush.bf16.msrb.mxu3 %v3448_v11  ;;  %v4897_v11 = vld [vmem:[#allocation5 + $0x524] sm:$0xf]  ;;  %v3368_v14 = vor.u32 %v4776_v7, %v3367_v6  ;;  %v4856_v58 = vld [vmem:[#allocation5 + $0x3d4] sm:$0xf0]  ;;  %v3815_v59 = vld [vmem:[#allocation5 + $0x4c8] sm:$0xf] }
  0x83   :  { %1655 = vmatpush.bf16.msrb.mxu0 %v3940_v17  ;;  %v4740_v17 = vld [vmem:[#allocation5 + $0x34] sm:$0xf0]  ;;  %v3860_v24 = vor.u32 %v4897_v11, %v3857_v12  ;;  %v3688_v0 = vor.u32 %v4856_v58, %v3687_v56  ;;  %v3671_v4 = vld [vmem:[#allocation5 + $0x3a8] sm:$0xf] }
  0x84   :  { %1668 = vmatpush.bf16.msrb.mxu1 %v4068_v21  ;;  %v3351_v21 = vld [vmem:[#allocation5 + $0x128] sm:$0xf]  ;;  %v3224_v28 = vor.u32 %v4740_v17, %v3223_v16  ;;  %v4820_v3 = vld [vmem:[#allocation5 + $0x2b4] sm:$0xf0] }
  0x85   :  { %1681 = vmatpush.bf16.msrb.mxu2 %v3304_v23  ;;  %v4772_v23 = vld [vmem:[#allocation5 + $0x134] sm:$0xf0]  ;;  %v3799_v7 = vld [vmem:[#allocation5 + $0x4a8] sm:$0xf] }
  0x86   :  { %1694 = vmatpush.bf16.msrb.mxu3 %v3432_v27  ;;  %v3988_v27 = vor.u32 %v4929_v13, %v3985_v15  ;;  %v3352_v32 = vor.u32 %v4772_v23, %v3351_v21  ;;  %v4852_v6 = vld [vmem:[#allocation5 + $0x3b4] sm:$0xf0]  ;;  %v3655_v16 = vld [vmem:[#allocation5 + $0x388] sm:$0xf] }
  0x87   :  { %1656 = vmatpush.bf16.msrb.mxu0 %v3924_v33  ;;  %v4736_v33 = vld [vmem:[#allocation5 + $0x14] sm:$0xf0]  ;;  %v3672_v12 = vor.u32 %v4852_v6, %v3671_v4  ;;  %v3783_v23 = vld [vmem:[#allocation5 + $0x488] sm:$0xf] }
  0x88   :  { %1669 = vmatpush.bf16.msrb.mxu1 %v4052_v34  ;;  %v3335_v34 = vld [vmem:[#allocation5 + $0x108] sm:$0xf]  ;;  %v3208_v47 = vor.u32 %v4736_v33, %v3207_v31  ;;  %v4816_v15 = vld [vmem:[#allocation5 + $0x294] sm:$0xf0] }
  0x89   :  { %1682 = vmatpush.bf16.msrb.mxu2 %v3288_v35  ;;  %v4768_v35 = vld [vmem:[#allocation5 + $0x114] sm:$0xf0]  ;;  %v3511_v30 = vld [vmem:[#allocation5 + $0x268] sm:$0xf] }
  0x8a   :  { %1695 = vmatpush.bf16.msrb.mxu3 %v3416_v42  ;;  %v3844_v42 = vor.u32 %v4893_v25, %v3841_v26  ;;  %v4848_v21 = vld [vmem:[#allocation5 + $0x394] sm:$0xf0]  ;;  %v3911_v25 = vld [vmem:[#allocation5 + $0x588] sm:$0xf] }
  0x8b   :  { %1657 = vmatpush.bf16.msrb.mxu0 %v3908_v48  ;;  %v3959_v48 = vld [vmem:[#allocation5 + $0x5e8] sm:$0xf]  ;;  %v4912_v26 = vld [vmem:[#allocation5 + $0x594] sm:$0xf0] }
  0x8c   :  { %1670 = vmatpush.bf16.msrb.mxu1 %v4036_v49  ;;  %v4924_v49 = vld [vmem:[#allocation5 + $0x5f4] sm:$0xf0]  ;;  %v3912_v33 = vor.u32 %v4912_v26, %v3911_v25  ;;  %v3895_v38 = vld [vmem:[#allocation5 + $0x568] sm:$0xf] }
  0x8d   :  { %1683 = vmatpush.bf16.msrb.mxu2 %v3272_v50  ;;  %v3336_v50 = vor.u32 %v4768_v35, %v3335_v34  ;;  %v3960_v57 = vor.u32 %v4924_v49, %v3959_v48  ;;  %v4812_v31 = vld [vmem:[#allocation5 + $0x274] sm:$0xf0]  ;;  %v3767_v35 = vld [vmem:[#allocation5 + $0x468] sm:$0xf] }
  0x8e   :  { %1696 = vmatpush.bf16.msrb.mxu3 %v3400_v54  ;;  %v3559_v54 = vld [vmem:[#allocation5 + $0x2c8] sm:$0xf]  ;;  %v4844_v34 = vld [vmem:[#allocation5 + $0x374] sm:$0xf0] }
  0x8f   :  { %1658 = vmatpush.bf16.msrb.mxu0 %v3892_v60  ;;  %v4888_v60 = vld [vmem:[#allocation5 + $0x4d4] sm:$0xf0]  ;;  %v3560_v63 = vor.u32 %v4824_v55, %v3559_v54  ;;  %v3495_v45 = vld [vmem:[#allocation5 + $0x248] sm:$0xf] }
  0x90   :  { %1671 = vmatpush.bf16.msrb.mxu1 %v4020_v61  ;;  %v3943_v61 = vld [vmem:[#allocation5 + $0x5c8] sm:$0xf]  ;;  %v3816_v1 = vor.u32 %v4888_v60, %v3815_v59  ;;  %v4876_v36 = vld [vmem:[#allocation5 + $0x474] sm:$0xf0] }
  0x91   :  { %1684 = vmatpush.bf16.msrb.mxu2 %v3256_v62  ;;  %v4920_v62 = vld [vmem:[#allocation5 + $0x5d4] sm:$0xf0]  ;;  %v3768_v44 = vor.u32 %v4876_v36, %v3767_v35  ;;  %v3607_v59 = vld [vmem:[#allocation5 + $0x328] sm:$0xf]  ;;  %v4758_v35 = vld [vmem:[#allocation5 + $0xcc] sm:$0xf] }
  0x92   :  { %1697 = vmatpush.bf16.msrb.mxu3 %v3384_v2  ;;  %v3543_v2 = vld [vmem:[#allocation5 + $0x2a8] sm:$0xf]  ;;  %v3944_v5 = vor.u32 %v4920_v62, %v3943_v61  ;;  %v4908_v39 = vld [vmem:[#allocation5 + $0x574] sm:$0xf0] }
  0x93   :  { %1659 = vmatpush.bf16.msrb.mxu0 %v3876_v8  ;;  %v4884_v8 = vld [vmem:[#allocation5 + $0x4b4] sm:$0xf0]  ;;  %v3544_v11 = vor.u32 %v4820_v3, %v3543_v2  ;;  %v3896_v48 = vor.u32 %v4908_v39, %v3895_v38  ;;  %v3735_v62 = vld [vmem:[#allocation5 + $0x428] sm:$0xf]  ;;  %v3305_v38 = vld [vmem:[#allocation5 + $0xd8] sm:$0xf0] }
  0x94   :  { %1672 = vmatpush.bf16.msrb.mxu1 %v4004_v9  ;;  %v3927_v9 = vld [vmem:[#allocation5 + $0x5a8] sm:$0xf]  ;;  %v3800_v13 = vor.u32 %v4884_v8, %v3799_v7  ;;  %v4840_v49 = vld [vmem:[#allocation5 + $0x354] sm:$0xf0]  ;;  %v4790_v39 = vld [vmem:[#allocation5 + $0x1cc] sm:$0xf] }
  0x95   :  { %1685 = vmatpush.bf16.msrb.mxu2 %v3240_v10  ;;  %v4916_v10 = vld [vmem:[#allocation5 + $0x5b4] sm:$0xf0]  ;;  %v3463_v3 = vld [vmem:[#allocation5 + $0x208] sm:$0xf] }
  0x96   :  { %1698 = vmatpush.bf16.msrb.mxu3 %v3368_v14  ;;  %v3527_v14 = vld [vmem:[#allocation5 + $0x288] sm:$0xf]  ;;  %v3928_v17 = vor.u32 %v4916_v10, %v3927_v9  ;;  %v4804_v58 = vld [vmem:[#allocation5 + $0x234] sm:$0xf0] }
  0x97   :  { %1660 = vmatpush.bf16.msrb.mxu0 %v3860_v24  ;;  %v4880_v24 = vld [vmem:[#allocation5 + $0x494] sm:$0xf0]  ;;  %v3591_v7 = vld [vmem:[#allocation5 + $0x308] sm:$0xf] }
  0x98   :  { %1673 = vmatpush.bf16.msrb.mxu1 %v3988_v27  ;;  %v3528_v27 = vor.u32 %v4816_v15, %v3527_v14  ;;  %v3784_v29 = vor.u32 %v4880_v24, %v3783_v23  ;;  %v4836_v61 = vld [vmem:[#allocation5 + $0x334] sm:$0xf0]  ;;  %v3719_v9 = vld [vmem:[#allocation5 + $0x408] sm:$0xf]  ;;  %v4794_v23 = vld [vmem:[#allocation5 + $0x1ec] sm:$0xf] }
  0x99   :  { %1686 = vmatpush.bf16.msrb.mxu2 %v3224_v28  ;;  %v3656_v28 = vor.u32 %v4848_v21, %v3655_v16  ;;  %v4800_v4 = vld [vmem:[#allocation5 + $0x214] sm:$0xf0]  ;;  %v4087_v14 = vld [vmem:[#allocation5 + $0x6e8] sm:$0xf]  ;;  %v4762_v16 = vld [vmem:[#allocation5 + $0xec] sm:$0xf] }
  0x9a   :  { %1699 = vmatpush.bf16.msrb.mxu3 %v3352_v32  ;;  %v3639_v32 = vld [vmem:[#allocation5 + $0x368] sm:$0xf]  ;;  %v4832_v8 = vld [vmem:[#allocation5 + $0x314] sm:$0xf0]  ;;  %v3321_v21 = vld [vmem:[#allocation5 + $0xf8] sm:$0xf0] }
  0x9b   :  { %1661 = vmatpush.bf16.msrb.mxu0 %v3844_v42  ;;  %v3512_v42 = vor.u32 %v4812_v31, %v3511_v30  ;;  %v3640_v43 = vor.u32 %v4844_v34, %v3639_v32  ;;  %v4956_v15 = vld [vmem:[#allocation5 + $0x6f4] sm:$0xf0]  ;;  %v3449_v24 = vld [vmem:[#allocation5 + $0x1f8] sm:$0xf0]  ;;  %v3592_v25 = vor.u32 %v4832_v8, %v3591_v7  ;;  %v3324_v31 = vor.u32 %v4762_v16, %v3321_v21  ;;  %v4023_v8 = vld [vmem:[#allocation5 + $0x668] sm:$0xf] }
  0x9c   :  { %1674 = vmatpush.bf16.msrb.mxu1 %v3972_v46  ;;  %v4808_v46 = vld [vmem:[#allocation5 + $0x254] sm:$0xf0]  ;;  %v4088_v30 = vor.u32 %v4956_v15, %v4087_v14  ;;  %v3452_v32 = vor.u32 %v4794_v23, %v3449_v24  ;;  %v3385_v14 = vld [vmem:[#allocation5 + $0x178] sm:$0xf0]  ;;  %v4810_v15 = vld [vmem:[#allocation5 + $0x26c] sm:$0xf] }
  0x9d   :  { %1687 = vmatpush.bf16.msrb.mxu2 %v3208_v47  ;;  %v3623_v47 = vld [vmem:[#allocation5 + $0x348] sm:$0xf]  ;;  %v3496_v54 = vor.u32 %v4808_v46, %v3495_v45  ;;  %v4952_v34 = vld [vmem:[#allocation5 + $0x6d4] sm:$0xf0]  ;;  %v3308_v46 = vor.u32 %v4758_v35, %v3305_v38  ;;  %v3513_v16 = vld [vmem:[#allocation5 + $0x278] sm:$0xf0] }
  0x9e   :  { %1700 = vmatpush.bf16.msrb.mxu3 %v3336_v50  ;;  %1662 = vmatmul.bf16.vlgmr.msrb.gmra.mxu0 %v5393_v41  ;;  %v3751_v50 = vld [vmem:[#allocation5 + $0x448] sm:$0xf]  ;;  %v3624_v55 = vor.u32 %v4840_v49, %v3623_v47  ;;  %v4948_v49 = vld [vmem:[#allocation5 + $0x6b4] sm:$0xf0] }
  0x9f   :  { %1706 = vmatpush.bf16.msra.mxu0 %v3576_v51  ;;  %1675 = vmatmul.bf16.vlgmr.msrb.gmra.mxu1 %v5389_v37  ;;  %v4872_v51 = vld [vmem:[#allocation5 + $0x454] sm:$0xf0]  ;;  %v4007_v24 = vld [vmem:[#allocation5 + $0x648] sm:$0xf] }
  0xa0   :  { %1719 = vmatpush.bf16.msra.mxu1 %v3704_v52  ;;  %1688 = vmatmul.bf16.vlgmr.msrb.gmra.mxu2 %v5379_v19  ;;  %v3879_v52 = vld [vmem:[#allocation5 + $0x548] sm:$0xf]  ;;  %v3752_v56 = vor.u32 %v4872_v51, %v3751_v50  ;;  %v4754_v50 = vld [vmem:[#allocation5 + $0xac] sm:$0xf] }
  0xa1   :  { %1732 = vmatpush.bf16.msra.mxu2 %v3832_v53  ;;  %1701 = vmatmul.bf16.vlgmr.msrb.gmra.mxu3 %v5383_v22  ;;  %v4904_v53 = vld [vmem:[#allocation5 + $0x554] sm:$0xf0]  ;;  %v3991_v38 = vld [vmem:[#allocation5 + $0x628] sm:$0xf] }
  0xa2   :  { %1745 = vmatpush.bf16.msra.mxu3 %v3960_v57  ;;  %v3479_v57 = vld [vmem:[#allocation5 + $0x228] sm:$0xf]  ;;  %v3880_v60 = vor.u32 %v4904_v53, %v3879_v52  ;;  %v3289_v52 = vld [vmem:[#allocation5 + $0xb8] sm:$0xf0]  ;;  %v4786_v53 = vld [vmem:[#allocation5 + $0x1ac] sm:$0xf] }
  0xa3   :  { %1707 = vmatpush.bf16.msra.mxu0 %v3560_v63  ;;  %v4868_v63 = vld [vmem:[#allocation5 + $0x434] sm:$0xf0]  ;;  %v3480_v2 = vor.u32 %v4804_v58, %v3479_v57  ;;  %v3292_v58 = vor.u32 %v4754_v50, %v3289_v52 }
  0xa4   :  { %1720 = vmatpush.bf16.msra.mxu1 %v3688_v0  ;;  %v3863_v0 = vld [vmem:[#allocation5 + $0x528] sm:$0xf]  ;;  %v3736_v6 = vor.u32 %v4868_v63, %v3735_v62  ;;  %v4750_v62 = vld [vmem:[#allocation5 + $0x8c] sm:$0xf]  ;;  %v4928_v52 = vld [vmem:[#allocation5 + $0x614] sm:$0xf0] }
  0xa5   :  { %1733 = vmatpush.bf16.msra.mxu2 %v3816_v1  ;;  %v4900_v1 = vld [vmem:[#allocation5 + $0x534] sm:$0xf0] }
  0xa6   :  { %1746 = vmatpush.bf16.msra.mxu3 %v3944_v5  ;;  %v3608_v5 = vor.u32 %v4836_v61, %v3607_v59  ;;  %v3864_v10 = vor.u32 %v4900_v1, %v3863_v0  ;;  %v4944_v61 = vld [vmem:[#allocation5 + $0x694] sm:$0xf0]  ;;  %v3273_v0 = vld [vmem:[#allocation5 + $0x98] sm:$0xf0]  ;;  %v4782_v1 = vld [vmem:[#allocation5 + $0x18c] sm:$0xf] }
  0xa7   :  { %1708 = vmatpush.bf16.msra.mxu0 %v3544_v11  ;;  %v4864_v11 = vld [vmem:[#allocation5 + $0x414] sm:$0xf0] }
  0xa8   :  { %1721 = vmatpush.bf16.msra.mxu1 %v3672_v12  ;;  %v3847_v12 = vld [vmem:[#allocation5 + $0x508] sm:$0xf]  ;;  %v3720_v26 = vor.u32 %v4864_v11, %v3719_v9  ;;  %v4940_v9 = vld [vmem:[#allocation5 + $0x674] sm:$0xf0] }
  0xa9   :  { %1734 = vmatpush.bf16.msra.mxu2 %v3800_v13  ;;  %v4896_v13 = vld [vmem:[#allocation5 + $0x514] sm:$0xf0] }
  0xaa   :  { %1747 = vmatpush.bf16.msra.mxu3 %v3928_v17  ;;  %v3464_v17 = vor.u32 %v4800_v4, %v3463_v3  ;;  %v4814_v3 = vld [vmem:[#allocation5 + $0x28c] sm:$0xf]  ;;  %v3529_v4 = vld [vmem:[#allocation5 + $0x298] sm:$0xf0] }
  0xab   :  { %1709 = vmatpush.bf16.msra.mxu0 %v3528_v27  ;;  %v4826_v27 = vld [vmem:[#allocation5 + $0x2ec] sm:$0xf]  ;;  %v3532_v11 = vor.u32 %v4814_v3, %v3529_v4  ;;  %v3833_v4 = vld [vmem:[#allocation5 + $0x4f8] sm:$0xf0] }
  0xac   :  { %1722 = vmatpush.bf16.msra.mxu1 %v3656_v28  ;;  %v3577_v28 = vld [vmem:[#allocation5 + $0x2f8] sm:$0xf0] }
  0xad   :  { %1735 = vmatpush.bf16.msra.mxu2 %v3784_v29  ;;  %v3848_v29 = vor.u32 %v4896_v13, %v3847_v12  ;;  %v3580_v36 = vor.u32 %v4826_v27, %v3577_v28  ;;  %v3257_v12 = vld [vmem:[#allocation5 + $0x78] sm:$0xf0]  ;;  %v4778_v13 = vld [vmem:[#allocation5 + $0x16c] sm:$0xf]  ;;  %v3516_v27 = vor.u32 %v4810_v15, %v3513_v16 }
  0xae   :  { %1748 = vmatpush.bf16.msra.mxu3 %v3912_v33  ;;  %v4071_v33 = vld [vmem:[#allocation5 + $0x6c8] sm:$0xf]  ;;  %v3388_v23 = vor.u32 %v4778_v13, %v3385_v14  ;;  %v3241_v28 = vld [vmem:[#allocation5 + $0x58] sm:$0xf0] }
  0xaf   :  { %1710 = vmatpush.bf16.msra.mxu0 %v3512_v42  ;;  %v3433_v42 = vld [vmem:[#allocation5 + $0x1d8] sm:$0xf0]  ;;  %v4072_v45 = vor.u32 %v4952_v34, %v4071_v33 }
  0xb0   :  { %1723 = vmatpush.bf16.msra.mxu1 %v3640_v43  ;;  %v4822_v43 = vld [vmem:[#allocation5 + $0x2cc] sm:$0xf]  ;;  %v3436_v47 = vor.u32 %v4790_v39, %v3433_v42  ;;  %v4932_v39 = vld [vmem:[#allocation5 + $0x634] sm:$0xf0] }
  0xb1   :  { %1736 = vmatpush.bf16.msra.mxu2 %v3768_v44  ;;  %v3561_v44 = vld [vmem:[#allocation5 + $0x2d8] sm:$0xf0]  ;;  %v4738_v42 = vld [vmem:[#allocation5 + $0x2c] sm:$0xf]  ;;  %v3992_v50 = vor.u32 %v4932_v39, %v3991_v38 }
  0xb2   :  { %1749 = vmatpush.bf16.msra.mxu3 %v3896_v48  ;;  %v4055_v48 = vld [vmem:[#allocation5 + $0x6a8] sm:$0xf]  ;;  %v3564_v51 = vor.u32 %v4822_v43, %v3561_v44  ;;  %v3673_v38 = vld [vmem:[#allocation5 + $0x3b8] sm:$0xf0]  ;;  %v4882_v39 = vld [vmem:[#allocation5 + $0x4ac] sm:$0xf] }
  0xb3   :  { %1711 = vmatpush.bf16.msra.mxu0 %v3496_v54  ;;  %v3417_v54 = vld [vmem:[#allocation5 + $0x1b8] sm:$0xf0]  ;;  %v4056_v57 = vor.u32 %v4948_v49, %v4055_v48  ;;  %v4802_v48 = vld [vmem:[#allocation5 + $0x22c] sm:$0xf] }
  0xb4   :  { %1724 = vmatpush.bf16.msra.mxu1 %v3624_v55  ;;  %v4818_v55 = vld [vmem:[#allocation5 + $0x2ac] sm:$0xf]  ;;  %v3420_v59 = vor.u32 %v4786_v53, %v3417_v54  ;;  %v3481_v49 = vld [vmem:[#allocation5 + $0x238] sm:$0xf0] }
  0xb5   :  { %1737 = vmatpush.bf16.msra.mxu2 %v3752_v56  ;;  %v3545_v56 = vld [vmem:[#allocation5 + $0x2b8] sm:$0xf0] }
  0xb6   :  { %1750 = vmatpush.bf16.msra.mxu3 %v3880_v60  ;;  %v4039_v60 = vld [vmem:[#allocation5 + $0x688] sm:$0xf]  ;;  %v3548_v63 = vor.u32 %v4818_v55, %v3545_v56  ;;  %v4734_v55 = vld [vmem:[#allocation5 + $0xc] sm:$0xf]  ;;  %v3209_v56 = vld [vmem:[#allocation5 + $0x18] sm:$0xf0] }
  0xb7   :  { %1712 = vmatpush.bf16.msra.mxu0 %v3480_v2  ;;  %v3401_v2 = vld [vmem:[#allocation5 + $0x198] sm:$0xf0] }
  0xb8   :  { %1725 = vmatpush.bf16.msra.mxu1 %v3608_v5  ;;  %v4040_v5 = vor.u32 %v4944_v61, %v4039_v60  ;;  %v3404_v7 = vor.u32 %v4782_v1, %v3401_v2  ;;  %v3337_v60 = vld [vmem:[#allocation5 + $0x118] sm:$0xf0]  ;;  %v4798_v61 = vld [vmem:[#allocation5 + $0x20c] sm:$0xf] }
  0xb9   :  { %1738 = vmatpush.bf16.msra.mxu2 %v3736_v6  ;;  %v3276_v6 = vor.u32 %v4750_v62, %v3273_v0  ;;  %v3465_v62 = vld [vmem:[#allocation5 + $0x218] sm:$0xf0]  ;;  %v4858_v0 = vld [vmem:[#allocation5 + $0x3ec] sm:$0xf] }
  0xba   :  { %1751 = vmatpush.bf16.msra.mxu3 %v3864_v10  ;;  %v4746_v10 = vld [vmem:[#allocation5 + $0x6c] sm:$0xf]  ;;  %v3705_v1 = vld [vmem:[#allocation5 + $0x3f8] sm:$0xf0]  ;;  %v3468_v13 = vor.u32 %v4798_v61, %v3465_v62 }
  0xbb   :  { %1713 = vmatpush.bf16.msra.mxu0 %v3464_v17  ;;  %v4024_v17 = vor.u32 %v4940_v9, %v4023_v8  ;;  %v3260_v21 = vor.u32 %v4746_v10, %v3257_v12  ;;  %v5411_v34 = vpop.f32.mrf.mxu0  ;;  %v4890_v2 = vld [vmem:[#allocation5 + $0x4ec] sm:$0xf]  ;;  %v3212_v8 = vor.u32 %v4734_v55, %v3209_v56  ;;  %v3708_v14 = vor.u32 %v4858_v0, %v3705_v1  ;;  %v3785_v56 = vld [vmem:[#allocation5 + $0x498] sm:$0xf0] }
  0xbc   :  { %1726 = vmatpush.bf16.msra.mxu1 %v3592_v25  ;;  %v4936_v25 = vld [vmem:[#allocation5 + $0x654] sm:$0xf0]  ;;  %v5413_v43 = vpop.f32.mrf.mxu1  ;;  %v4954_v10 = vld [vmem:[#allocation5 + $0x6ec] sm:$0xf]  ;;  %v3836_v15 = vor.u32 %v4890_v2, %v3833_v4  ;;  %v3641_v2 = vld [vmem:[#allocation5 + $0x378] sm:$0xf0] }
  0xbd   :  { %1739 = vmatpush.bf16.msra.mxu2 %v3720_v26  ;;  %v4742_v26 = vld [vmem:[#allocation5 + $0x4c] sm:$0xf]  ;;  %v4008_v33 = vor.u32 %v4936_v25, %v4007_v24  ;;  %v3817_v25 = vld [vmem:[#allocation5 + $0x4d8] sm:$0xf0] }
  0xbe   :  { %1752 = vmatpush.bf16.msra.mxu3 %v3848_v29  ;;  %1714 = vmatmul.bf16.vlgmr.msra.gmra.mxu0 %v5377_v18  ;;  %v4774_v29 = vld [vmem:[#allocation5 + $0x14c] sm:$0xf]  ;;  %v3244_v35 = vor.u32 %v4742_v26, %v3241_v28 }
  0xbf   :  { %1758 = vmatpush.bf16.msrb.mxu0 %v4088_v30  ;;  %1727 = vmatmul.bf16.vlgmr.msra.gmra.mxu1 %v5381_v20  ;;  %v3369_v30 = vld [vmem:[#allocation5 + $0x158] sm:$0xf0]  ;;  %v4918_v26 = vld [vmem:[#allocation5 + $0x5cc] sm:$0xf] }
  0xc0   :  { %1771 = vmatpush.bf16.msrb.mxu1 %v3324_v31  ;;  %1740 = vmatmul.bf16.vlgmr.msra.gmra.mxu2 %v5391_v40  ;;  %v4806_v31 = vld [vmem:[#allocation5 + $0x24c] sm:$0xf] }
  0xc1   :  { %1784 = vmatpush.bf16.msrb.mxu2 %v3452_v32  ;;  %1753 = vmatmul.bf16.vlgmr.msra.gmra.mxu3 %v5393_v41  ;;  %v3497_v32 = vld [vmem:[#allocation5 + $0x258] sm:$0xf0]  ;;  %v4950_v28 = vld [vmem:[#allocation5 + $0x6cc] sm:$0xf] }
  0xc2   :  { %1797 = vmatpush.bf16.msrb.mxu3 %v3580_v36  ;;  %v3372_v36 = vor.u32 %v4774_v29, %v3369_v30  ;;  %v3500_v44 = vor.u32 %v4806_v31, %v3497_v32  ;;  %v4073_v29 = vld [vmem:[#allocation5 + $0x6d8] sm:$0xf0]  ;;  %v4842_v1 = vld [vmem:[#allocation5 + $0x36c] sm:$0xf] }
  0xc3   :  { %1759 = vmatpush.bf16.msrb.mxu0 %v4072_v45  ;;  %v3225_v45 = vld [vmem:[#allocation5 + $0x38] sm:$0xf0] }
  0xc4   :  { %1772 = vmatpush.bf16.msrb.mxu1 %v3308_v46  ;;  %v4770_v46 = vld [vmem:[#allocation5 + $0x12c] sm:$0xf]  ;;  %v3228_v53 = vor.u32 %v4738_v42, %v3225_v45  ;;  %v1522_v12 = vpop.f32.mrf.mxu1  ;;  %v4076_v42 = vor.u32 %v4950_v28, %v4073_v29  ;;  %v5431_v28 = vld [vmem:[#allocation7] sm:$0xf] }
  0xc5   :  { %1785 = vmatpush.bf16.msrb.mxu2 %v3436_v47  ;;  %v3353_v47 = vld [vmem:[#allocation5 + $0x138] sm:$0xf0]  ;;  %v4914_v45 = vld [vmem:[#allocation5 + $0x5ac] sm:$0xf] }
  0xc6   :  { %1798 = vmatpush.bf16.msrb.mxu3 %v3564_v51  ;;  %v3975_v51 = vld [vmem:[#allocation5 + $0x608] sm:$0xf]  ;;  %v3356_v54 = vor.u32 %v4770_v46, %v3353_v47  ;;  %v3929_v46 = vld [vmem:[#allocation5 + $0x5b8] sm:$0xf0]  ;;  %v4946_v47 = vld [vmem:[#allocation5 + $0x6ac] sm:$0xf] }
  0xc7   :  { %1760 = vmatpush.bf16.msrb.mxu0 %v4056_v57  ;;  %v4766_v57 = vld [vmem:[#allocation5 + $0x10c] sm:$0xf]  ;;  %v3976_v3 = vor.u32 %v4928_v52, %v3975_v51  ;;  %v3932_v51 = vor.u32 %v4914_v45, %v3929_v46  ;;  %v3865_v45 = vld [vmem:[#allocation5 + $0x538] sm:$0xf0] }
  0xc8   :  { %1773 = vmatpush.bf16.msrb.mxu1 %v3292_v58  ;;  %v3340_v9 = vor.u32 %v4766_v57, %v3337_v60  ;;  %v4846_v52 = vld [vmem:[#allocation5 + $0x38c] sm:$0xf]  ;;  %v4041_v60 = vld [vmem:[#allocation5 + $0x698] sm:$0xf0] }
  0xc9   :  { %1786 = vmatpush.bf16.msrb.mxu2 %v3420_v59  ;;  %v3484_v59 = vor.u32 %v4802_v48, %v3481_v49  ;;  %v4057_v48 = vld [vmem:[#allocation5 + $0x6b8] sm:$0xf0]  ;;  %v4910_v57 = vld [vmem:[#allocation5 + $0x58c] sm:$0xf] }
  0xca   :  { %1799 = vmatpush.bf16.msrb.mxu3 %v3548_v63  ;;  %v4060_v55 = vor.u32 %v4946_v47, %v4057_v48  ;;  %v4930_v46 = vld [vmem:[#allocation5 + $0x62c] sm:$0xf]  ;;  %v3993_v47 = vld [vmem:[#allocation5 + $0x638] sm:$0xf0]  ;;  %v345_v48 = vperm.slane %v5431_v28, 0 }
  0xcb   :  { %1761 = vmatpush.bf16.msrb.mxu0 %v4040_v5  ;;  %v4922_v5 = vld [vmem:[#allocation5 + $0x5ec] sm:$0xf] }
  0xcc   :  { %1774 = vmatpush.bf16.msrb.mxu1 %v3276_v6  ;;  %v3961_v6 = vld [vmem:[#allocation5 + $0x5f8] sm:$0xf0] }
  0xcd   :  { %1787 = vmatpush.bf16.msrb.mxu2 %v3404_v7  ;;  %v5415_v58 = vpop.f32.mrf.mxu2  ;;  %v1509_v7 = vpop.f32.mrf.mxu0  ;;  %v3964_v16 = vor.u32 %v4922_v5, %v3961_v6  ;;  %v3769_v5 = vld [vmem:[#allocation5 + $0x478] sm:$0xf0]  ;;  %v4906_v6 = vld [vmem:[#allocation5 + $0x56c] sm:$0xf] }
  0xce   :  { %1800 = vmatpush.bf16.msrb.mxu3 %v3532_v11  ;;  %v5417_v63 = vpop.f32.mrf.mxu3  ;;  %v4089_v11 = vld [vmem:[#allocation5 + $0x6f8] sm:$0xf0] }
  0xcf   :  { %1762 = vmatpush.bf16.msrb.mxu0 %v4024_v17  ;;  %v4854_v17 = vld [vmem:[#allocation5 + $0x3cc] sm:$0xf]  ;;  %v4092_v24 = vor.u32 %v4954_v10, %v4089_v11  ;;  %v3897_v7 = vld [vmem:[#allocation5 + $0x578] sm:$0xf0]  ;;  %v3644_v10 = vor.u32 %v4842_v1, %v3641_v2 }
  0xd0   :  { %1775 = vmatpush.bf16.msrb.mxu1 %v3260_v21  ;;  %v3689_v21 = vld [vmem:[#allocation5 + $0x3d8] sm:$0xf0]  ;;  %v3900_v12 = vor.u32 %v4906_v6, %v3897_v7 }
  0xd1   :  { %1788 = vmatpush.bf16.msrb.mxu2 %v3388_v23  ;;  %v4886_v23 = vld [vmem:[#allocation5 + $0x4cc] sm:$0xf]  ;;  %v3692_v31 = vor.u32 %v4854_v17, %v3689_v21  ;;  %v3753_v21 = vld [vmem:[#allocation5 + $0x458] sm:$0xf0] }
  0xd2   :  { %1801 = vmatpush.bf16.msrb.mxu3 %v3516_v27  ;;  %v3945_v27 = vld [vmem:[#allocation5 + $0x5d8] sm:$0xf0] }
  0xd3   :  { %1763 = vmatpush.bf16.msrb.mxu0 %v4008_v33  ;;  %v3820_v33 = vor.u32 %v4886_v23, %v3817_v25  ;;  %v4902_v23 = vld [vmem:[#allocation5 + $0x54c] sm:$0xf] }
  0xd4   :  { %1776 = vmatpush.bf16.msrb.mxu1 %v3244_v35  ;;  %v3948_v35 = vor.u32 %v4918_v26, %v3945_v27  ;;  %v4934_v25 = vld [vmem:[#allocation5 + $0x64c] sm:$0xf]  ;;  %v4009_v26 = vld [vmem:[#allocation5 + $0x658] sm:$0xf0] }
  0xd5   :  { %1789 = vmatpush.bf16.msrb.mxu2 %v3372_v36  ;;  %v1535_v30 = vpop.f32.mrf.mxu2  ;;  %v4850_v36 = vld [vmem:[#allocation5 + $0x3ac] sm:$0xf] }
  0xd6   :  { %1802 = vmatpush.bf16.msrb.mxu3 %v3500_v44  ;;  %v1548_v32 = vpop.f32.mrf.mxu3  ;;  %v3801_v44 = vld [vmem:[#allocation5 + $0x4b8] sm:$0xf0]  ;;  %v3676_v49 = vor.u32 %v4850_v36, %v3673_v38  ;;  %v4866_v38 = vld [vmem:[#allocation5 + $0x42c] sm:$0xf] }
  0xd7   :  { %1764 = vmatpush.bf16.msrb.mxu0 %v3992_v50  ;;  %v3804_v50 = vor.u32 %v4882_v39, %v3801_v44  ;;  %v3609_v36 = vld [vmem:[#allocation5 + $0x338] sm:$0xf0]  ;;  %v4012_v39 = vor.u32 %v4934_v25, %v4009_v26  ;;  %v4898_v44 = vld [vmem:[#allocation5 + $0x52c] sm:$0xf]  ;;  %v5011_v25 = vld [vmem:[#allocation8 + $0x1ac] sm:$0xf0] }
  0xd8   :  { %1777 = vmatpush.bf16.msrb.mxu1 %v3228_v53  ;;  %v3657_v53 = vld [vmem:[#allocation5 + $0x398] sm:$0xf0] }
  0xd9   :  { %1790 = vmatpush.bf16.msrb.mxu2 %v3356_v54  ;;  %v4878_v54 = vld [vmem:[#allocation5 + $0x48c] sm:$0xf] }
  0xda   :  { %1803 = vmatpush.bf16.msrb.mxu3 %v3484_v59  ;;  %v4942_v59 = vld [vmem:[#allocation5 + $0x68c] sm:$0xf] }
  0xdb   :  { %1765 = vmatpush.bf16.msrb.mxu0 %v3976_v3  ;;  %v5423_v61 = vpop.f32.mrf.mxu0  ;;  %v4874_v3 = vld [vmem:[#allocation5 + $0x46c] sm:$0xf]  ;;  %v4044_v4 = vor.u32 %v4942_v59, %v4041_v60  ;;  %v3849_v59 = vld [vmem:[#allocation5 + $0x518] sm:$0xf0] }
  0xdc   :  { %1778 = vmatpush.bf16.msrb.mxu1 %v3212_v8  ;;  %v5425_v62 = vpop.f32.mrf.mxu1  ;;  %v4938_v8 = vld [vmem:[#allocation5 + $0x66c] sm:$0xf]  ;;  %v3772_v11 = vor.u32 %v4874_v3, %v3769_v5  ;;  %v4335_v3 = vld [vmem:[#allocation8 + $0x1e0] sm:$0xf] }
  0xdd   :  { %1791 = vmatpush.bf16.msrb.mxu2 %v3340_v9  ;;  %v4025_v9 = vld [vmem:[#allocation5 + $0x678] sm:$0xf0]  ;;  %v4926_v60 = vld [vmem:[#allocation5 + $0x60c] sm:$0xf] }
  0xde   :  { %1804 = vmatpush.bf16.msrb.mxu3 %v3468_v13  ;;  %1766 = vmatmul.bf16.vlgmr.msrb.gmra.mxu0 %v5389_v37  ;;  %v4838_v13 = vld [vmem:[#allocation5 + $0x34c] sm:$0xf]  ;;  %v4028_v17 = vor.u32 %v4938_v8, %v4025_v9  ;;  %v1508_v9 = vadd.f32 %v5411_v34, %v345_v48  ;;  %v4303_v34 = vld [vmem:[#allocation8 + $0x1a0] sm:$0xf] }
  0xdf   :  { %1810 = vmatpush.bf16.msra.mxu0 %v3708_v14  ;;  %1779 = vmatmul.bf16.vlgmr.msrb.gmra.mxu1 %v5379_v19  ;;  %v3788_v19 = vor.u32 %v4878_v54, %v3785_v56  ;;  %v3625_v14 = vld [vmem:[#allocation5 + $0x358] sm:$0xf0]  ;;  %v4862_v54 = vld [vmem:[#allocation5 + $0x40c] sm:$0xf] }
  0xe0   :  { %1823 = vmatpush.bf16.msra.mxu1 %v3836_v15  ;;  %1792 = vmatmul.bf16.vlgmr.msrb.gmra.mxu2 %v5383_v22  ;;  %v3913_v22 = vld [vmem:[#allocation5 + $0x598] sm:$0xf0]  ;;  %v4870_v15 = vld [vmem:[#allocation5 + $0x44c] sm:$0xf]  ;;  %v3628_v29 = vor.u32 %v4838_v13, %v3625_v14  ;;  %v4319_v13 = vld [vmem:[#allocation8 + $0x1c0] sm:$0xf] }
  0xe1   :  { %1836 = vmatpush.bf16.msra.mxu2 %v3964_v16  ;;  %1805 = vmatmul.bf16.vlgmr.msrb.gmra.mxu3 %v5377_v18  ;;  %v3660_v18 = vor.u32 %v4846_v52, %v3657_v53  ;;  %v3916_v0 = vor.u32 %v4910_v57, %v3913_v22  ;;  %v3756_v32 = vor.u32 %v4870_v15, %v3753_v21  ;;  %v3593_v53 = vld [vmem:[#allocation5 + $0x318] sm:$0xf0]  ;;  %v4894_v22 = vld [vmem:[#allocation5 + $0x50c] sm:$0xf]  ;;  %v5015_v14 = vld [vmem:[#allocation8 + $0x1cc] sm:$0xf0] }
  0xe2   :  { %1849 = vmatpush.bf16.msra.mxu3 %v4092_v24  ;;  %v3881_v24 = vld [vmem:[#allocation5 + $0x558] sm:$0xf0]  ;;  %v3868_v52 = vor.u32 %v4898_v44, %v3865_v45  ;;  %v3996_v57 = vor.u32 %v4930_v46, %v3993_v47  ;;  %v3852_v6 = vor.u32 %v4894_v22, %v3849_v59  ;;  %v4320_v21 = vor.u32 %v5015_v14, %v4319_v13  ;;  %v4127_v44 = vld [vmem:[#allocation8 + $0x40] sm:$0xf]  ;;  %v4967_v47 = vld [vmem:[#allocation8 + $0x4c] sm:$0xf0] }
  0xe3   :  { %1811 = vmatpush.bf16.msra.mxu0 %v3692_v31  ;;  %v5427_v16 = vpop.f32.mrf.mxu2  ;;  %v1561_v30 = vpop.f32.mrf.mxu0  ;;  %v4963_v59 = vld [vmem:[#allocation8 + $0x2c] sm:$0xf0]  ;;  %v4985_v13 = vld [vmem:[#allocation8 + $0xe4] sm:$0xf]  ;;  %v4209_v14 = vld [vmem:[#allocation8 + $0xf0] sm:$0xf0] }
  0xe4   :  { %1824 = vmatpush.bf16.msra.mxu1 %v3820_v33  ;;  %v5429_v27 = vpop.f32.mrf.mxu3  ;;  %v1574_v31 = vpop.f32.mrf.mxu1  ;;  %v3884_v33 = vor.u32 %v4902_v23, %v3881_v24  ;;  %v4175_v23 = vld [vmem:[#allocation8 + $0xa0] sm:$0xf]  ;;  %v4979_v24 = vld [vmem:[#allocation8 + $0xac] sm:$0xf0] }
  0xe5   :  { %1837 = vmatpush.bf16.msra.mxu2 %v3948_v35  ;;  %v4834_v35 = vld [vmem:[#allocation5 + $0x32c] sm:$0xf]  ;;  %v4176_v26 = vor.u32 %v4979_v24, %v4175_v23  ;;  %v4159_v30 = vld [vmem:[#allocation8 + $0x80] sm:$0xf]  ;;  %v4975_v31 = vld [vmem:[#allocation8 + $0x8c] sm:$0xf0] }
  0xe6   :  { %1850 = vmatpush.bf16.msra.mxu3 %v4076_v42  ;;  %v3737_v42 = vld [vmem:[#allocation5 + $0x438] sm:$0xf0] }
  0xe7   :  { %1812 = vmatpush.bf16.msra.mxu0 %v3676_v49  ;;  %v3612_v49 = vor.u32 %v4834_v35, %v3609_v36  ;;  %v4143_v36 = vld [vmem:[#allocation8 + $0x60] sm:$0xf] }
  0xe8   :  { %1825 = vmatpush.bf16.msra.mxu1 %v3804_v50  ;;  %v4830_v50 = vld [vmem:[#allocation5 + $0x30c] sm:$0xf] }
  0xe9   :  { %1838 = vmatpush.bf16.msra.mxu2 %v3932_v51  ;;  %v3740_v51 = vor.u32 %v4866_v38, %v3737_v42  ;;  %v3596_v2 = vor.u32 %v4830_v50, %v3593_v53  ;;  %v4971_v38 = vld [vmem:[#allocation8 + $0x6c] sm:$0xf0]  ;;  %v4255_v50 = vld [vmem:[#allocation8 + $0x140] sm:$0xf] }
  0xea   :  { %1851 = vmatpush.bf16.msra.mxu3 %v4060_v55  ;;  %v3721_v55 = vld [vmem:[#allocation5 + $0x418] sm:$0xf0]  ;;  %v5003_v42 = vld [vmem:[#allocation8 + $0x16c] sm:$0xf0] }
  0xeb   :  { %1813 = vmatpush.bf16.msra.mxu0 %v3660_v18  ;;  %v1587_v56 = vpop.f32.mrf.mxu2  ;;  %v3977_v18 = vld [vmem:[#allocation5 + $0x618] sm:$0xf0]  ;;  %v3724_v5 = vor.u32 %v4862_v54, %v3721_v55  ;;  %v346_v54 = vperm.slane %v5431_v28, 1  ;;  %v4128_v55 = vor.u32 %v4967_v47, %v4127_v44 }
  0xec   :  { %1826 = vmatpush.bf16.msra.mxu1 %v3788_v19  ;;  %v4207_v19 = vld [vmem:[#allocation8 + $0xe0] sm:$0xf]  ;;  %v1600_v1 = vpop.f32.mrf.mxu3  ;;  %v3980_v7 = vor.u32 %v4926_v60, %v3977_v18 }
  0xed   :  { %1839 = vmatpush.bf16.msra.mxu2 %v3916_v0  ;;  %v4987_v0 = vld [vmem:[#allocation8 + $0xec] sm:$0xf0]  ;;  %v4111_v56 = vld [vmem:[#allocation8 + $0x20] sm:$0xf] }
  0xee   :  { %1852 = vmatpush.bf16.msra.mxu3 %v4044_v4  ;;  %v5019_v4 = vld [vmem:[#allocation8 + $0x1ec] sm:$0xf0]  ;;  %v4208_v8 = vor.u32 %v4987_v0, %v4207_v19  ;;  %v4447_v18 = vld [vmem:[#allocation8 + $0x2c0] sm:$0xf] }
  0xef   :  { %1814 = vmatpush.bf16.msra.mxu0 %v3644_v10  ;;  %v4336_v10 = vor.u32 %v5019_v4, %v4335_v3  ;;  %v5047_v19 = vld [vmem:[#allocation8 + $0x2cc] sm:$0xf0]  ;;  %v4239_v0 = vld [vmem:[#allocation8 + $0x120] sm:$0xf]  ;;  %v1599_v3 = vadd.f32 %v5429_v27, %v346_v54  ;;  %v4112_v4 = vor.u32 %v4963_v59, %v4111_v56  ;;  %v4337_v27 = vld [vmem:[#allocation8 + $0x1f0] sm:$0xf0] }
  0xf0   :  { %1827 = vmatpush.bf16.msra.mxu1 %v3772_v11  ;;  %v4191_v11 = vld [vmem:[#allocation8 + $0xc0] sm:$0xf]  ;;  %v4995_v1 = vld [vmem:[#allocation8 + $0x12c] sm:$0xf0]  ;;  %v4289_v56 = vld [vmem:[#allocation8 + $0x190] sm:$0xf0] }
  0xf1   :  { %1840 = vmatpush.bf16.msra.mxu2 %v3900_v12  ;;  %v4983_v12 = vld [vmem:[#allocation8 + $0xcc] sm:$0xf0]  ;;  %v4367_v59 = vld [vmem:[#allocation8 + $0x220] sm:$0xf] }
  0xf2   :  { %1853 = vmatpush.bf16.msra.mxu3 %v4028_v17  ;;  %v4192_v15 = vor.u32 %v4983_v12, %v4191_v11  ;;  %v1521_v17 = vadd.f32 %v5413_v43, %v1508_v9  ;;  %v4304_v43 = vor.u32 %v5011_v25, %v4303_v34  ;;  %v5043_v11 = vld [vmem:[#allocation8 + $0x2ac] sm:$0xf0]  ;;  %v4212_v25 = vor.u32 %v4985_v13, %v4209_v14  ;;  %v4465_v13 = vld [vmem:[#allocation8 + $0x2f0] sm:$0xf0]  ;;  %v4997_v14 = vld [vmem:[#allocation8 + $0x144] sm:$0xf] }
  0xf3   :  { %1815 = vmatpush.bf16.msra.mxu0 %v3628_v29  ;;  %v4991_v12 = vld [vmem:[#allocation8 + $0x10c] sm:$0xf0] }
  0xf4   :  { %1828 = vmatpush.bf16.msra.mxu1 %v3756_v32  ;;  %v1534_v29 = vadd.f32 %v5415_v58, %v1521_v17  ;;  %v5007_v32 = vld [vmem:[#allocation8 + $0x18c] sm:$0xf0]  ;;  %v4144_v58 = vor.u32 %v4971_v38, %v4143_v36  ;;  %v4399_v36 = vld [vmem:[#allocation8 + $0x260] sm:$0xf] }
  0xf5   :  { %1841 = vmatpush.bf16.msra.mxu2 %v3884_v33  ;;  %v4160_v33 = vor.u32 %v4975_v31, %v4159_v30  ;;  %v4981_v30 = vld [vmem:[#allocation8 + $0xc4] sm:$0xf]  ;;  %v4193_v31 = vld [vmem:[#allocation8 + $0xd0] sm:$0xf0]  ;;  %v5035_v38 = vld [vmem:[#allocation8 + $0x26c] sm:$0xf0] }
  0xf6   :  { %1854 = vmatpush.bf16.msra.mxu3 %v4012_v39  ;;  %v4271_v39 = vld [vmem:[#allocation8 + $0x160] sm:$0xf]  ;;  %v4400_v44 = vor.u32 %v5035_v38, %v4399_v36  ;;  %v4989_v36 = vld [vmem:[#allocation8 + $0x104] sm:$0xf]  ;;  %v4225_v38 = vld [vmem:[#allocation8 + $0x110] sm:$0xf0] }
  0xf7   :  { %1816 = vmatpush.bf16.msra.mxu0 %v3612_v49  ;;  %v4272_v46 = vor.u32 %v5003_v42, %v4271_v39  ;;  %v4463_v49 = vld [vmem:[#allocation8 + $0x2e0] sm:$0xf]  ;;  %v4977_v42 = vld [vmem:[#allocation8 + $0xa4] sm:$0xf] }
  0xf8   :  { %1829 = vmatpush.bf16.msra.mxu1 %v3740_v51  ;;  %v4999_v51 = vld [vmem:[#allocation8 + $0x14c] sm:$0xf0] }
  0xf9   :  { %1842 = vmatpush.bf16.msra.mxu2 %v3868_v52  ;;  %v4256_v22 = vor.u32 %v4999_v51, %v4255_v50  ;;  %v4973_v51 = vld [vmem:[#allocation8 + $0x84] sm:$0xf] }
  0xfa   :  { %1855 = vmatpush.bf16.msra.mxu3 %v3996_v57 }
  0xfb   :  { %1817 = vmatpush.bf16.msra.mxu0 %v3596_v2  ;;  %v1611_v35 = vpop.f32.mrf.mxu0  ;;  %v4448_v2 = vor.u32 %v5047_v19, %v4447_v18 }
  0xfc   :  { %1830 = vmatpush.bf16.msra.mxu1 %v3724_v5  ;;  %v4095_v5 = vld [vmem:[#allocation8] sm:$0xf]  ;;  %v1612_v23 = vadd.f32 %v1611_v35, %v1599_v3  ;;  %v5001_v3 = vld [vmem:[#allocation8 + $0x164] sm:$0xf] }
  0xfd   :  { %1843 = vmatpush.bf16.msra.mxu2 %v3852_v6  ;;  %v4959_v6 = vld [vmem:[#allocation8 + $0xc] sm:$0xf0] }
  0xfe   :  { %1856 = vmatpush.bf16.msra.mxu3 %v3980_v7  ;;  %1818 = vmatmul.bf16.vlgmr.msra.gmra.mxu0 %v5381_v20  ;;  %v4287_v20 = vld [vmem:[#allocation8 + $0x180] sm:$0xf]  ;;  %v4096_v24 = vor.u32 %v4959_v6, %v4095_v5  ;;  %v4965_v6 = vld [vmem:[#allocation8 + $0x44] sm:$0xf] }
  0xff   :  { %2648 = vmatpush.bf16.msrb.mxu0 %v4208_v8  ;;  %1831 = vmatmul.bf16.vlgmr.msra.gmra.mxu1 %v5391_v40  ;;  %v1547_v40 = vadd.f32 %v5417_v63, %v1534_v29  ;;  %v5051_v63 = vld [vmem:[#allocation8 + $0x2ec] sm:$0xf0]  ;;  %v4223_v8 = vld [vmem:[#allocation8 + $0x100] sm:$0xf] }
 0x100   :  { %2661 = vmatpush.bf16.msrb.mxu1 %v4336_v10  ;;  %1844 = vmatmul.bf16.vlgmr.msra.gmra.mxu2 %v5393_v41  ;;  %v4288_v41 = vor.u32 %v5007_v32, %v4287_v20  ;;  %v4464_v53 = vor.u32 %v5051_v63, %v4463_v49  ;;  %v4431_v10 = vld [vmem:[#allocation8 + $0x2a0] sm:$0xf]  ;;  %v5039_v29 = vld [vmem:[#allocation8 + $0x28c] sm:$0xf0]  ;;  %v5013_v32 = vld [vmem:[#allocation8 + $0x1c4] sm:$0xf] }
 0x101   :  { %1857 = vmatmul.bf16.vlgmr.msra.gmra.mxu3 %v5389_v37  ;;  %v5442_v37 = vpop.f32.mrf.mxu1  ;;  %v1560_v45 = vadd.f32 %v5423_v61, %v1547_v40  ;;  %v4432_v17 = vor.u32 %v5043_v11, %v4431_v10  ;;  %v4383_v49 = vld [vmem:[#allocation8 + $0x240] sm:$0xf]  ;;  %v5031_v63 = vld [vmem:[#allocation8 + $0x24c] sm:$0xf0] }
 0x102   :  { %2674 = vmatpush.bf16.msrb.mxu2 %v4464_v53  ;;  %v1625_v40 = vadd.f32 %v5442_v37, %v1612_v23  ;;  %v4161_v53 = vld [vmem:[#allocation8 + $0x90] sm:$0xf0]  ;;  %v4384_v54 = vor.u32 %v5031_v63, %v4383_v49  ;;  %v4343_v49 = vld [vmem:[#allocation8 + $0x1e8] sm:$0xf]  ;;  %v5020_v63 = vld [vmem:[#allocation8 + $0x1f4] sm:$0xf0] }
 0x103   :  { %2649 = vmatpush.bf16.msrb.mxu0 %v4192_v15  ;;  %v5445_v48 = vpop.f32.mrf.mxu2  ;;  %v1613_v57 = vpop.f32.mrf.mxu0  ;;  %v1573_v61 = vadd.f32 %v5425_v62, %v1560_v45  ;;  %v4240_v62 = vor.u32 %v4995_v1, %v4239_v0  ;;  %v5009_v45 = vld [vmem:[#allocation8 + $0x1a4] sm:$0xf]  ;;  %v4145_v1 = vld [vmem:[#allocation8 + $0x70] sm:$0xf0] }
 0x104   :  { %2662 = vmatpush.bf16.msrb.mxu1 %v4320_v21  ;;  %v5447_v52 = vpop.f32.mrf.mxu3  ;;  %v5017_v21 = vld [vmem:[#allocation8 + $0x1e4] sm:$0xf]  ;;  %v1638_v37 = vadd.f32 %v5445_v48, %v1625_v40  ;;  %v5027_v48 = vld [vmem:[#allocation8 + $0x22c] sm:$0xf0] }
 0x105   :  { %v1586_v7 = vadd.f32 %v5427_v16, %v1573_v61  ;;  %v4224_v16 = vor.u32 %v4991_v12, %v4223_v8  ;;  %v4969_v0 = vld [vmem:[#allocation8 + $0x64] sm:$0xf]  ;;  %v5023_v8 = vld [vmem:[#allocation8 + $0x20c] sm:$0xf0] }
 0x106   :  { %2675 = vmatpush.bf16.msrb.mxu2 %v4448_v2  ;;  %v1651_v57 = vadd.f32 %v5447_v52, %v1638_v37  ;;  %v4368_v2 = vor.u32 %v5027_v48, %v4367_v59  ;;  %v4148_v52 = vor.u32 %v4969_v0, %v4145_v1  ;;  %v5049_v12 = vld [vmem:[#allocation8 + $0x2e4] sm:$0xf]  ;;  %v4344_v59 = vor.u32 %v5020_v63, %v4343_v49  ;;  %v4984_v48 = vld [vmem:[#allocation8 + $0xd4] sm:$0xf0]  ;;  %v4327_v0 = vld [vmem:[#allocation8 + $0x1c8] sm:$0xf] }
 0x107   :  { %2650 = vmatpush.bf16.msrb.mxu0 %v4176_v26  ;;  %v1862_v34 = vmax.f32 %v1586_v7, 0.0  ;;  %v4415_v26 = vld [vmem:[#allocation8 + $0x280] sm:$0xf]  ;;  %v4129_v7 = vld [vmem:[#allocation8 + $0x50] sm:$0xf0] }
 0x108   :  { %2663 = vmatpush.bf16.msrb.mxu1 %v4304_v43  ;;  %v4340_v43 = vor.u32 %v5017_v21, %v4337_v27  ;;  %v4416_v20 = vor.u32 %v5039_v29, %v4415_v26  ;;  %v4132_v23 = vor.u32 %v4965_v6, %v4129_v7  ;;  %v4113_v26 = vld [vmem:[#allocation8 + $0x30] sm:$0xf0]  ;;  %v5016_v1 = vld [vmem:[#allocation8 + $0x1d4] sm:$0xf0]  ;;  %v5075_v6 = vld [vmem:[#allocation8 + $0x3ac] sm:$0xf0] }
 0x109   :  { %v1626_v60 = vpop.f32.mrf.mxu1  ;;  %v5454_v35 = vpack.c.bf16 %v1862_v34, %v1862_v34  ;;  %v4980_v7 = vld [vmem:[#allocation8 + $0xb4] sm:$0xf0]  ;;  %v4511_v49 = vld [vmem:[#allocation8 + $0x340] sm:$0xf]  ;;  %v5063_v63 = vld [vmem:[#allocation8 + $0x34c] sm:$0xf0] }
 0x10a   :  { %2676 = vmatpush.bf16.msrb.mxu2 %v4432_v17  ;;  %v4468_v17 = vor.u32 %v5049_v12, %v4465_v13 }
 0x10b   :  { %2651 = vmatpush.bf16.msrb.mxu0 %v4160_v33  ;;  %v1639_v9 = vpop.f32.mrf.mxu2  ;;  %v4321_v33 = vld [vmem:[#allocation8 + $0x1d0] sm:$0xf0] }
 0x10c   :  { %2664 = vmatpush.bf16.msrb.mxu1 %v4288_v41  ;;  %v1652_v15 = vpop.f32.mrf.mxu3  ;;  %v4196_v41 = vor.u32 %v4981_v30, %v4193_v31  ;;  %v4324_v39 = vor.u32 %v5013_v32, %v4321_v33  ;;  %v4449_v30 = vld [vmem:[#allocation8 + $0x2d0] sm:$0xf0]  ;;  %v4993_v31 = vld [vmem:[#allocation8 + $0x124] sm:$0xf] }
 0x10d   :  { %v4257_v15 = vld [vmem:[#allocation8 + $0x150] sm:$0xf0]  ;;  %v4957_v33 = vld [vmem:[#allocation8 + $0x4] sm:$0xf] }
 0x10e   :  { %2677 = vmatpush.bf16.msrb.mxu2 %v4416_v20  ;;  %v4241_v20 = vld [vmem:[#allocation8 + $0x130] sm:$0xf0] }
 0x10f   :  { %2652 = vmatpush.bf16.msrb.mxu0 %v4144_v58  ;;  %v4177_v58 = vld [vmem:[#allocation8 + $0xb0] sm:$0xf0] }
 0x110   :  { %2665 = vmatpush.bf16.msrb.mxu1 %v4272_v46  ;;  %v4305_v46 = vld [vmem:[#allocation8 + $0x1b0] sm:$0xf0]  ;;  %v4180_v47 = vor.u32 %v4977_v42, %v4177_v58  ;;  %v4591_v42 = vld [vmem:[#allocation8 + $0x3e0] sm:$0xf]  ;;  %v5083_v58 = vld [vmem:[#allocation8 + $0x3ec] sm:$0xf0] }
 0x111   :  { %v4308_v50 = vor.u32 %v5009_v45, %v4305_v46  ;;  %v4215_v45 = vld [vmem:[#allocation8 + $0xe8] sm:$0xf]  ;;  %v4988_v46 = vld [vmem:[#allocation8 + $0xf4] sm:$0xf0]  ;;  %v4592_v37 = vor.u32 %v5083_v58, %v4591_v42 }
 0x112   :  { %2678 = vmatpush.bf16.msrb.mxu2 %v4400_v44  ;;  %v5041_v44 = vld [vmem:[#allocation8 + $0x2a4] sm:$0xf]  ;;  %v4279_v42 = vld [vmem:[#allocation8 + $0x168] sm:$0xf]  ;;  %v5004_v58 = vld [vmem:[#allocation8 + $0x174] sm:$0xf0] }
 0x113   :  { %2653 = vmatpush.bf16.msrb.mxu0 %v4128_v55  ;;  %v5005_v55 = vld [vmem:[#allocation8 + $0x184] sm:$0xf]  ;;  %2687 = vmatpush.bf16.msrb.mxu3 %v4592_v37 }
 0x114   :  { %2666 = vmatpush.bf16.msrb.mxu1 %v4256_v22  ;;  %v4164_v22 = vor.u32 %v4973_v51, %v4161_v53  ;;  %v4292_v18 = vor.u32 %v5005_v55, %v4289_v56  ;;  %v4228_v55 = vor.u32 %v4989_v36, %v4225_v38  ;;  %v4216_v56 = vor.u32 %v4988_v46, %v4215_v45  ;;  %v5025_v38 = vld [vmem:[#allocation8 + $0x224] sm:$0xf] }
 0x116   :  { %2679 = vmatpush.bf16.msrb.mxu2 %v4384_v54 }
 0x117   :  { %2654 = vmatpush.bf16.msrb.mxu0 %v4112_v4  ;;  %v4273_v4 = vld [vmem:[#allocation8 + $0x170] sm:$0xf0] }
 0x118   :  { %2667 = vmatpush.bf16.msrb.mxu1 %v4240_v62  ;;  %v4351_v62 = vld [vmem:[#allocation8 + $0x200] sm:$0xf]  ;;  %v4276_v10 = vor.u32 %v5001_v3, %v4273_v4  ;;  %v4183_v4 = vld [vmem:[#allocation8 + $0xa8] sm:$0xf] }
 0x119   :  { %v4352_v11 = vor.u32 %v5023_v8, %v4351_v62  ;;  %v5033_v8 = vld [vmem:[#allocation8 + $0x264] sm:$0xf]  ;;  %v4184_v13 = vor.u32 %v4980_v7, %v4183_v4  ;;  %v4996_v4 = vld [vmem:[#allocation8 + $0x134] sm:$0xf0] }
 0x11a   :  { %2680 = vmatpush.bf16.msrb.mxu2 %v4368_v2 }
 0x11b   :  { %2655 = vmatpush.bf16.msrb.mxu0 %v4096_v24  ;;  %v1663_v61 = vpop.f32.mrf.mxu0  ;;  %v4961_v24 = vld [vmem:[#allocation8 + $0x24] sm:$0xf] }
 0x11c   :  { %2668 = vmatpush.bf16.msrb.mxu1 %v4224_v16  ;;  %v1664_v60 = vadd.f32 %v1663_v61, %v1651_v57  ;;  %v1676_v19 = vpop.f32.mrf.mxu1  ;;  %v4116_v40 = vor.u32 %v4961_v24, %v4113_v26  ;;  %v4199_v57 = vld [vmem:[#allocation8 + $0xc8] sm:$0xf]  ;;  %v4575_v61 = vld [vmem:[#allocation8 + $0x3c0] sm:$0xf]  ;;  %v4385_v26 = vld [vmem:[#allocation8 + $0x250] sm:$0xf0] }
 0x11d   :  { %v4200_v3 = vor.u32 %v4984_v48, %v4199_v57  ;;  %v4167_v24 = vld [vmem:[#allocation8 + $0x88] sm:$0xf] }
 0x11e   :  { %2656 = vmatmul.bf16.vlgmr.msrb.gmra.mxu0 %v5454_v35  ;;  %v1677_v5 = vadd.f32 %v1676_v19, %v1664_v60  ;;  %2681 = vmatpush.bf16.msrb.mxu2 %v4352_v11  ;;  %v4417_v19 = vld [vmem:[#allocation8 + $0x290] sm:$0xf0]  ;;  %v5012_v11 = vld [vmem:[#allocation8 + $0x1b4] sm:$0xf0]  ;;  %v4263_v57 = vld [vmem:[#allocation8 + $0x148] sm:$0xf] }
 0x11f   :  { %2700 = vmatpush.bf16.msra.mxu0 %v4212_v25  ;;  %v4260_v25 = vor.u32 %v4997_v14, %v4257_v15  ;;  %v4543_v14 = vld [vmem:[#allocation8 + $0x380] sm:$0xf]  ;;  %v5071_v15 = vld [vmem:[#allocation8 + $0x38c] sm:$0xf0] }
 0x120   :  { %2713 = vmatpush.bf16.msra.mxu1 %v4340_v43  ;;  %v1863_v9 = vmax.f32 %v1677_v5, 0.0  ;;  %v5045_v43 = vld [vmem:[#allocation8 + $0x2c4] sm:$0xf]  ;;  %v4559_v5 = vld [vmem:[#allocation8 + $0x3a0] sm:$0xf] }
 0x121   :  { %v4452_v32 = vor.u32 %v5045_v43, %v4449_v30  ;;  %v4560_v62 = vor.u32 %v5075_v6, %v4559_v5  ;;  %v5008_v43 = vld [vmem:[#allocation8 + $0x194] sm:$0xf0] }
 0x122   :  { %v5459_v21 = vpack.c.bf16 %v1863_v9, %v1863_v9  ;;  %2726 = vmatpush.bf16.msra.mxu2 %v4468_v17  ;;  %v4401_v9 = vld [vmem:[#allocation8 + $0x270] sm:$0xf0]  ;;  %v5029_v17 = vld [vmem:[#allocation8 + $0x244] sm:$0xf] }
 0x123   :  { %2701 = vmatpush.bf16.msra.mxu0 %v4196_v41  ;;  %v5461_v27 = vpop.f32.mrf.mxu2  ;;  %v1665_v16 = vpop.f32.mrf.mxu0  ;;  %v4097_v41 = vld [vmem:[#allocation8 + $0x10] sm:$0xf0]  ;;  %v4404_v12 = vor.u32 %v5033_v8, %v4401_v9  ;;  %v4388_v30 = vor.u32 %v5029_v17, %v4385_v26  ;;  %v4960_v8 = vld [vmem:[#allocation8 + $0x14] sm:$0xf0]  ;;  %v4479_v9 = vld [vmem:[#allocation8 + $0x300] sm:$0xf] }
 0x124   :  { %2714 = vmatpush.bf16.msra.mxu1 %v4324_v39  ;;  %v5463_v34 = vpop.f32.mrf.mxu3  ;;  %v1678_v29 = vpop.f32.mrf.mxu1  ;;  %v4244_v39 = vor.u32 %v4993_v31, %v4241_v20  ;;  %v4100_v53 = vor.u32 %v4957_v33, %v4097_v41  ;;  %v4976_v16 = vld [vmem:[#allocation8 + $0x94] sm:$0xf0]  ;;  %v4151_v20 = vld [vmem:[#allocation8 + $0x68] sm:$0xf]  ;;  %v5067_v33 = vld [vmem:[#allocation8 + $0x36c] sm:$0xf0] }
 0x125   :  { %2669 = vmatmul.bf16.vlgmr.msrb.gmra.mxu1 %v5459_v21  ;;  %v4295_v29 = vld [vmem:[#allocation8 + $0x188] sm:$0xf]  ;;  %v4168_v31 = vor.u32 %v4976_v16, %v4167_v24  ;;  %v4972_v41 = vld [vmem:[#allocation8 + $0x74] sm:$0xf0]  ;;  %v4217_v24 = vld [vmem:[#allocation8 + $0xf8] sm:$0xf0] }
 0x126   :  { %2727 = vmatpush.bf16.msra.mxu2 %v4452_v32  ;;  %v4527_v32 = vld [vmem:[#allocation8 + $0x360] sm:$0xf]  ;;  %v4152_v37 = vor.u32 %v4972_v41, %v4151_v20  ;;  %v4992_v17 = vld [vmem:[#allocation8 + $0x114] sm:$0xf0]  ;;  %v4345_v26 = vld [vmem:[#allocation8 + $0x1f8] sm:$0xf0] }
 0x127   :  { %2702 = vmatpush.bf16.msra.mxu0 %v4180_v47  ;;  %v4433_v47 = vld [vmem:[#allocation8 + $0x2b0] sm:$0xf0]  ;;  %v4528_v36 = vor.u32 %v5067_v33, %v4527_v32  ;;  %v5077_v32 = vld [vmem:[#allocation8 + $0x3c4] sm:$0xf]  ;;  %v4982_v41 = vld [vmem:[#allocation8 + $0xcc] sm:$0xf] }
 0x128   :  { %2715 = vmatpush.bf16.msra.mxu1 %v4308_v50  ;;  %v4436_v51 = vor.u32 %v5041_v44, %v4433_v47  ;;  %v4135_v47 = vld [vmem:[#allocation8 + $0x48] sm:$0xf]  ;;  %v4577_v33 = vld [vmem:[#allocation8 + $0x3d0] sm:$0xf0] }
 0x12a   :  { %2728 = vmatpush.bf16.msra.mxu2 %v4436_v51  ;;  %v4968_v51 = vld [vmem:[#allocation8 + $0x54] sm:$0xf0] }
 0x12b   :  { %2703 = vmatpush.bf16.msra.mxu0 %v4164_v22  ;;  %v1691_v50 = vpop.f32.mrf.mxu2  ;;  %v5079_v22 = vld [vmem:[#allocation8 + $0x3cc] sm:$0xf0]  ;;  %v4136_v48 = vor.u32 %v4968_v51, %v4135_v47  ;;  %v5010_v51 = vld [vmem:[#allocation8 + $0x1ac] sm:$0xf] }
 0x12c   :  { %2716 = vmatpush.bf16.msra.mxu1 %v4292_v18  ;;  %v1704_v54 = vpop.f32.mrf.mxu3  ;;  %v4576_v60 = vor.u32 %v5079_v22, %v4575_v61  ;;  %v5037_v18 = vld [vmem:[#allocation8 + $0x284] sm:$0xf]  ;;  %v4280_v50 = vor.u32 %v5004_v58, %v4279_v42  ;;  %v5000_v61 = vld [vmem:[#allocation8 + $0x154] sm:$0xf0]  ;;  %v4329_v42 = vld [vmem:[#allocation8 + $0x1d8] sm:$0xf0] }
 0x12d   :  { %v4420_v2 = vor.u32 %v5037_v18, %v4417_v19  ;;  %v5021_v54 = vld [vmem:[#allocation8 + $0x204] sm:$0xf]  ;;  %v4495_v18 = vld [vmem:[#allocation8 + $0x320] sm:$0xf]  ;;  %v4264_v19 = vor.u32 %v5000_v61, %v4263_v57  ;;  %v4974_v61 = vld [vmem:[#allocation8 + $0x8c] sm:$0xf] }
 0x12e   :  { %2688 = vmatpush.bf16.msrb.mxu3 %v4576_v60 }
 0x12f   :  { %2704 = vmatpush.bf16.msra.mxu0 %v4148_v52  ;;  %v4328_v52 = vor.u32 %v5016_v1, %v4327_v0  ;;  %2729 = vmatpush.bf16.msra.mxu2 %v4420_v2  ;;  %v4119_v0 = vld [vmem:[#allocation8 + $0x28] sm:$0xf]  ;;  %v4964_v1 = vld [vmem:[#allocation8 + $0x34] sm:$0xf0]  ;;  %v5059_v2 = vld [vmem:[#allocation8 + $0x32c] sm:$0xf0] }
 0x130   :  { %2717 = vmatpush.bf16.msra.mxu1 %v4276_v10  ;;  %v4311_v10 = vld [vmem:[#allocation8 + $0x1a8] sm:$0xf]  ;;  %v4496_v6 = vor.u32 %v5059_v2, %v4495_v18  ;;  %v5006_v18 = vld [vmem:[#allocation8 + $0x18c] sm:$0xf]  ;;  %v4529_v2 = vld [vmem:[#allocation8 + $0x370] sm:$0xf0] }
 0x132   :  { %2689 = vmatpush.bf16.msrb.mxu3 %v4560_v62  ;;  %v4120_v62 = vor.u32 %v4964_v1, %v4119_v0  ;;  %v5065_v1 = vld [vmem:[#allocation8 + $0x364] sm:$0xf] }
 0x133   :  { %2705 = vmatpush.bf16.msra.mxu0 %v4132_v23  ;;  %v4312_v23 = vor.u32 %v5012_v11, %v4311_v10  ;;  %2730 = vmatpush.bf16.msra.mxu2 %v4404_v12  ;;  %v5055_v10 = vld [vmem:[#allocation8 + $0x30c] sm:$0xf0]  ;;  %v4231_v12 = vld [vmem:[#allocation8 + $0x108] sm:$0xf] }
 0x134   :  { %2718 = vmatpush.bf16.msra.mxu1 %v4260_v25  ;;  %v4544_v25 = vor.u32 %v5071_v15, %v4543_v14  ;;  %v5081_v14 = vld [vmem:[#allocation8 + $0x3e4] sm:$0xf]  ;;  %v4593_v15 = vld [vmem:[#allocation8 + $0x3f0] sm:$0xf0] }
 0x135   :  { %v4596_v16 = vor.u32 %v5081_v14, %v4593_v15  ;;  %v4966_v15 = vld [vmem:[#allocation8 + $0x4c] sm:$0xf] }
 0x136   :  { %2690 = vmatpush.bf16.msrb.mxu3 %v4544_v25  ;;  %v5018_v25 = vld [vmem:[#allocation8 + $0x1ec] sm:$0xf] }
 0x137   :  { %2706 = vmatpush.bf16.msra.mxu0 %v4116_v40  ;;  %v4296_v40 = vor.u32 %v5008_v43, %v4295_v29  ;;  %2731 = vmatpush.bf16.msra.mxu2 %v4388_v30 }
 0x138   :  { %2719 = vmatpush.bf16.msra.mxu1 %v4244_v39  ;;  %v4369_v39 = vld [vmem:[#allocation8 + $0x230] sm:$0xf0] }
 0x139   :  { %v4372_v45 = vor.u32 %v5025_v38, %v4369_v39  ;;  %v4580_v38 = vor.u32 %v5077_v32, %v4577_v33  ;;  %v5014_v39 = vld [vmem:[#allocation8 + $0x1cc] sm:$0xf] }
 0x13a   :  { %2691 = vmatpush.bf16.msrb.mxu3 %v4528_v36  ;;  %v4201_v36 = vld [vmem:[#allocation8 + $0xd8] sm:$0xf0] }
 0x13b   :  { %2707 = vmatpush.bf16.msra.mxu0 %v4100_v53  ;;  %v5468_v44 = vpop.f32.mrf.mxu0  ;;  %2732 = vmatpush.bf16.msra.mxu2 %v4372_v45  ;;  %v4512_v53 = vor.u32 %v5063_v63, %v4511_v49  ;;  %v4204_v58 = vor.u32 %v4982_v41, %v4201_v36  ;;  %v5073_v45 = vld [vmem:[#allocation8 + $0x3a4] sm:$0xf]  ;;  %v4332_v49 = vor.u32 %v5014_v39, %v4329_v42  ;;  %v4978_v63 = vld [vmem:[#allocation8 + $0xac] sm:$0xf] }
 0x13c   :  { %2720 = vmatpush.bf16.msra.mxu1 %v4228_v55  ;;  %v5470_v46 = vpop.f32.mrf.mxu1  ;;  %v4353_v55 = vld [vmem:[#allocation8 + $0x210] sm:$0xf0]  ;;  %v4994_v36 = vld [vmem:[#allocation8 + $0x12c] sm:$0xf] }
 0x13d   :  { %v4356_v22 = vor.u32 %v5021_v54, %v4353_v55  ;;  %v5069_v54 = vld [vmem:[#allocation8 + $0x384] sm:$0xf]  ;;  %v4545_v55 = vld [vmem:[#allocation8 + $0x390] sm:$0xf0] }
 0x13e   :  { %2708 = vmatmul.bf16.vlgmr.msra.gmra.mxu0 %v5454_v35  ;;  %2692 = vmatpush.bf16.msrb.mxu3 %v4512_v53  ;;  %v4313_v53 = vld [vmem:[#allocation8 + $0x1b8] sm:$0xf0] }
 0x13f   :  { %2752 = vmatpush.bf16.msrb.mxu0 %v4216_v56  ;;  %2721 = vmatmul.bf16.vlgmr.msra.gmra.mxu1 %v5459_v21  ;;  %v347_v56 = vperm.slane %v5431_v28, 2  ;;  %v4247_v28 = vld [vmem:[#allocation8 + $0x128] sm:$0xf] }
 0x140   :  { %2765 = vmatpush.bf16.msrb.mxu1 %v4344_v59  ;;  %2733 = vmatpush.bf16.msra.mxu2 %v4356_v22  ;;  %v4248_v11 = vor.u32 %v4996_v4, %v4247_v28  ;;  %v4169_v22 = vld [vmem:[#allocation8 + $0x98] sm:$0xf0]  ;;  %v4970_v4 = vld [vmem:[#allocation8 + $0x6c] sm:$0xf] }
 0x141   :  { %v4172_v0 = vor.u32 %v4974_v61, %v4169_v22 }
 0x142   :  { %2693 = vmatpush.bf16.msrb.mxu3 %v4496_v6 }
 0x143   :  { %2753 = vmatpush.bf16.msrb.mxu0 %v4200_v3  ;;  %v5473_v59 = vpop.f32.mrf.mxu2  ;;  %v1690_v3 = vadd.f32 %v5461_v27, %v347_v56  ;;  %v1717_v5 = vpop.f32.mrf.mxu0 }
 0x144   :  { %2766 = vmatpush.bf16.msrb.mxu1 %v4328_v52  ;;  %v5475_v60 = vpop.f32.mrf.mxu3  ;;  %v4103_v52 = vld [vmem:[#allocation8 + $0x8] sm:$0xf]  ;;  %v1730_v7 = vpop.f32.mrf.mxu1  ;;  %v4153_v5 = vld [vmem:[#allocation8 + $0x78] sm:$0xf0] }
 0x145   :  { %v1703_v27 = vadd.f32 %v5463_v34, %v1690_v3  ;;  %v4104_v43 = vor.u32 %v4960_v8, %v4103_v52  ;;  %v4348_v34 = vor.u32 %v5018_v25, %v4345_v26  ;;  %v5002_v52 = vld [vmem:[#allocation8 + $0x16c] sm:$0xf]  ;;  %v4281_v7 = vld [vmem:[#allocation8 + $0x178] sm:$0xf0]  ;;  %v4471_v8 = vld [vmem:[#allocation8 + $0x2e8] sm:$0xf] }
 0x146   :  { %v4455_v26 = vld [vmem:[#allocation8 + $0x2c8] sm:$0xf] }
 0x147   :  { %2754 = vmatpush.bf16.msrb.mxu0 %v4184_v13  ;;  %v4480_v13 = vor.u32 %v5055_v10, %v4479_v9  ;;  %v5052_v9 = vld [vmem:[#allocation8 + $0x2f4] sm:$0xf0]  ;;  %v4156_v10 = vor.u32 %v4970_v4, %v4153_v5  ;;  %v4391_v5 = vld [vmem:[#allocation8 + $0x248] sm:$0xf] }
 0x148   :  { %2767 = vmatpush.bf16.msrb.mxu1 %v4312_v23  ;;  %v4986_v23 = vld [vmem:[#allocation8 + $0xec] sm:$0xf] }
 0x149   :  { %2694 = vmatpush.bf16.msrb.mxu3 %v4480_v13  ;;  %v4220_v20 = vor.u32 %v4986_v23, %v4217_v24  ;;  %v4513_v13 = vld [vmem:[#allocation8 + $0x350] sm:$0xf0]  ;;  %v4998_v23 = vld [vmem:[#allocation8 + $0x14c] sm:$0xf]  ;;  %v4265_v24 = vld [vmem:[#allocation8 + $0x158] sm:$0xf0] }
 0x14b   :  { %2755 = vmatpush.bf16.msrb.mxu0 %v4168_v31  ;;  %v1743_v29 = vpop.f32.mrf.mxu2  ;;  %v4232_v31 = vor.u32 %v4992_v17, %v4231_v12  ;;  %v5061_v12 = vld [vmem:[#allocation8 + $0x344] sm:$0xf]  ;;  %v4472_v17 = vor.u32 %v5052_v9, %v4471_v8 }
 0x14c   :  { %2768 = vmatpush.bf16.msrb.mxu1 %v4296_v40  ;;  %v1756_v30 = vpop.f32.mrf.mxu3  ;;  %v1716_v40 = vadd.f32 %v5468_v44, %v1703_v27  ;;  %v4137_v27 = vld [vmem:[#allocation8 + $0x58] sm:$0xf0]  ;;  %v5048_v29 = vld [vmem:[#allocation8 + $0x2d4] sm:$0xf0] }
 0x14d   :  { %2739 = vmatpush.bf16.msra.mxu3 %v4596_v16  ;;  %v4516_v16 = vor.u32 %v5061_v12, %v4513_v13  ;;  %v5057_v30 = vld [vmem:[#allocation8 + $0x324] sm:$0xf]  ;;  %v4456_v41 = vor.u32 %v5048_v29, %v4455_v26  ;;  %v4359_v12 = vld [vmem:[#allocation8 + $0x208] sm:$0xf]  ;;  %v5024_v13 = vld [vmem:[#allocation8 + $0x214] sm:$0xf0] }
 0x14e   :  { %v1729_v47 = vadd.f32 %v5470_v46, %v1716_v40  ;;  %v4316_v46 = vor.u32 %v5010_v51, %v4313_v53  ;;  %v4962_v40 = vld [vmem:[#allocation8 + $0x2c] sm:$0xf] }
 0x14f   :  { %2756 = vmatpush.bf16.msrb.mxu0 %v4152_v37  ;;  %v4561_v37 = vld [vmem:[#allocation8 + $0x3b0] sm:$0xf0]  ;;  %v4958_v51 = vld [vmem:[#allocation8 + $0xc] sm:$0xf] }
 0x150   :  { %2769 = vmatpush.bf16.msrb.mxu1 %v4280_v50  ;;  %v4185_v50 = vld [vmem:[#allocation8 + $0xb8] sm:$0xf0]  ;;  %v4564_v44 = vor.u32 %v5073_v45, %v4561_v37  ;;  %v1742_v57 = vadd.f32 %v5473_v59, %v1729_v47  ;;  %v4532_v59 = vor.u32 %v5065_v1, %v4529_v2  ;;  %v5044_v45 = vld [vmem:[#allocation8 + $0x2b4] sm:$0xf0]  ;;  %v4407_v2 = vld [vmem:[#allocation8 + $0x268] sm:$0xf] }
 0x151   :  { %2740 = vmatpush.bf16.msra.mxu3 %v4580_v38  ;;  %v4188_v56 = vor.u32 %v4978_v63, %v4185_v50  ;;  %v4249_v38 = vld [vmem:[#allocation8 + $0x138] sm:$0xf0]  ;;  %v4481_v63 = vld [vmem:[#allocation8 + $0x310] sm:$0xf0] }
 0x152   :  { %v1755_v3 = vadd.f32 %v5475_v60, %v1742_v57  ;;  %v4284_v60 = vor.u32 %v5002_v52, %v4281_v7  ;;  %v4252_v50 = vor.u32 %v4994_v36, %v4249_v38  ;;  %v4423_v57 = vld [vmem:[#allocation8 + $0x288] sm:$0xf]  ;;  %v5038_v38 = vld [vmem:[#allocation8 + $0x28c] sm:$0xf] }
 0x153   :  { %2757 = vmatpush.bf16.msrb.mxu0 %v4136_v48  ;;  %v4548_v48 = vor.u32 %v5069_v54, %v4545_v55  ;;  %v4990_v54 = vld [vmem:[#allocation8 + $0x10c] sm:$0xf]  ;;  %v4233_v55 = vld [vmem:[#allocation8 + $0x118] sm:$0xf0]  ;;  %v4375_v7 = vld [vmem:[#allocation8 + $0x228] sm:$0xf] }
 0x154   :  { %2770 = vmatpush.bf16.msrb.mxu1 %v4264_v19  ;;  %v4297_v19 = vld [vmem:[#allocation8 + $0x198] sm:$0xf0]  ;;  %v4236_v22 = vor.u32 %v4990_v54, %v4233_v55 }
 0x155   :  { %2741 = vmatpush.bf16.msra.mxu3 %v4564_v44  ;;  %v4300_v28 = vor.u32 %v5006_v18, %v4297_v19  ;;  %v4105_v44 = vld [vmem:[#allocation8 + $0x18] sm:$0xf0] }
 0x156   :  { %v4108_v61 = vor.u32 %v4958_v51, %v4105_v44  ;;  %v4409_v51 = vld [vmem:[#allocation8 + $0x278] sm:$0xf0]  ;;  %v4567_v44 = vld [vmem:[#allocation8 + $0x3a8] sm:$0xf] }
 0x157   :  { %2758 = vmatpush.bf16.msrb.mxu0 %v4120_v62 }
 0x158   :  { %2771 = vmatpush.bf16.msrb.mxu1 %v4248_v11 }
 0x159   :  { %2742 = vmatpush.bf16.msra.mxu3 %v4548_v48 }
 0x15b   :  { %2759 = vmatpush.bf16.msrb.mxu0 %v4104_v43  ;;  %v1767_v6 = vpop.f32.mrf.mxu0  ;;  %v4140_v43 = vor.u32 %v4966_v15, %v4137_v27  ;;  %v4360_v15 = vor.u32 %v5024_v13, %v4359_v12  ;;  %v5046_v27 = vld [vmem:[#allocation8 + $0x2cc] sm:$0xf]  ;;  %v4487_v13 = vld [vmem:[#allocation8 + $0x308] sm:$0xf] }
 0x15c   :  { %2772 = vmatpush.bf16.msrb.mxu1 %v4232_v31  ;;  %v1768_v62 = vadd.f32 %v1767_v6, %v1755_v3  ;;  %v5485_v11 = vpop.f32.mrf.mxu1  ;;  %v4497_v31 = vld [vmem:[#allocation8 + $0x330] sm:$0xf0]  ;;  %v5036_v3 = vld [vmem:[#allocation8 + $0x274] sm:$0xf0] }
 0x15d   :  { %2743 = vmatpush.bf16.msra.mxu3 %v4532_v59  ;;  %v4500_v42 = vor.u32 %v5057_v30, %v4497_v31  ;;  %v5032_v59 = vld [vmem:[#allocation8 + $0x254] sm:$0xf0]  ;;  %v5042_v31 = vld [vmem:[#allocation8 + $0x2ac] sm:$0xf] }
 0x15e   :  { %2760 = vmatmul.bf16.vlgmr.msrb.gmra.mxu0 %v5454_v35  ;;  %v1864_v14 = vmax.f32 %v1768_v62, 0.0  ;;  %v4392_v6 = vor.u32 %v5032_v59, %v4391_v5  ;;  %v5028_v62 = vld [vmem:[#allocation8 + $0x234] sm:$0xf0]  ;;  %v4519_v59 = vld [vmem:[#allocation8 + $0x348] sm:$0xf] }
 0x15f   :  { %2804 = vmatpush.bf16.msra.mxu0 %v4220_v20  ;;  %2773 = vmatmul.bf16.vlgmr.msrb.gmra.mxu1 %v5459_v21  ;;  %v4268_v20 = vor.u32 %v4998_v23, %v4265_v24  ;;  %v4376_v8 = vor.u32 %v5028_v62, %v4375_v7  ;;  %v4503_v62 = vld [vmem:[#allocation8 + $0x328] sm:$0xf] }
 0x160   :  { %2817 = vmatpush.bf16.msra.mxu1 %v4348_v34  ;;  %v5487_v25 = vpack.c.bf16 %v1864_v14, %v1864_v14  ;;  %v4121_v34 = vld [vmem:[#allocation8 + $0x38] sm:$0xf0]  ;;  %v5050_v14 = vld [vmem:[#allocation8 + $0x2ec] sm:$0xf] }
 0x161   :  { %2744 = vmatpush.bf16.msra.mxu3 %v4516_v16  ;;  %v4124_v37 = vor.u32 %v4962_v40, %v4121_v34  ;;  %v5084_v40 = vld [vmem:[#allocation8 + $0x3f4] sm:$0xf0] }
 0x162   :  { %2682 = vmatmul.bf16.vlgmr.msrb.gmra.mxu2 %v5487_v25 }
 0x163   :  { %2805 = vmatpush.bf16.msra.mxu0 %v4204_v58  ;;  %v1793_v32 = vpop.f32.mrf.mxu2  ;;  %2778 = vmatpush.bf16.msrb.mxu2 %v4472_v17  ;;  %v1769_v39 = vpop.f32.mrf.mxu0  ;;  %v4439_v58 = vld [vmem:[#allocation8 + $0x2a8] sm:$0xf]  ;;  %v4457_v17 = vld [vmem:[#allocation8 + $0x2d8] sm:$0xf0] }
 0x164   :  { %2818 = vmatpush.bf16.msra.mxu1 %v4332_v49  ;;  %v1806_v33 = vpop.f32.mrf.mxu3  ;;  %v1782_v47 = vpop.f32.mrf.mxu1  ;;  %v5053_v49 = vld [vmem:[#allocation8 + $0x304] sm:$0xf]  ;;  %v4440_v53 = vor.u32 %v5044_v45, %v4439_v58  ;;  %v4425_v39 = vld [vmem:[#allocation8 + $0x298] sm:$0xf0]  ;;  %v4583_v58 = vld [vmem:[#allocation8 + $0x3c8] sm:$0xf] }
 0x165   :  { %2745 = vmatpush.bf16.msra.mxu3 %v4500_v42  ;;  %v5080_v45 = vld [vmem:[#allocation8 + $0x3d4] sm:$0xf0] }
 0x167   :  { %2806 = vmatpush.bf16.msra.mxu0 %v4188_v56  ;;  %2779 = vmatpush.bf16.msrb.mxu2 %v4456_v41  ;;  %v4484_v56 = vor.u32 %v5053_v49, %v4481_v63  ;;  %v4428_v49 = vor.u32 %v5038_v38, %v4425_v39  ;;  %v4584_v63 = vor.u32 %v5080_v45, %v4583_v58  ;;  %v5062_v38 = vld [vmem:[#allocation8 + $0x34c] sm:$0xf]  ;;  %v4521_v39 = vld [vmem:[#allocation8 + $0x358] sm:$0xf0] }
 0x168   :  { %2819 = vmatpush.bf16.msra.mxu1 %v4316_v46  ;;  %v5040_v46 = vld [vmem:[#allocation8 + $0x294] sm:$0xf0]  ;;  %v4524_v45 = vor.u32 %v5062_v38, %v4521_v39 }
 0x169   :  { %v4424_v19 = vor.u32 %v5040_v46, %v4423_v57  ;;  %2746 = vmatpush.bf16.msra.mxu3 %v4484_v56  ;;  %v5030_v56 = vld [vmem:[#allocation8 + $0x24c] sm:$0xf]  ;;  %v4393_v57 = vld [vmem:[#allocation8 + $0x258] sm:$0xf0]  ;;  %v4551_v46 = vld [vmem:[#allocation8 + $0x388] sm:$0xf] }
 0x16a   :  { %v5115_v39 = vld [vmem:[#allocation11 + $0xf0] sm:$0xff] }
 0x16b   :  { %2807 = vmatpush.bf16.msra.mxu0 %v4172_v0  ;;  %v1795_v48 = vpop.f32.mrf.mxu2  ;;  %2780 = vmatpush.bf16.msrb.mxu2 %v4440_v53  ;;  %v5129_v0 = vld [vmem:[#allocation7] sm:$0xf]  ;;  %v5076_v53 = vld [vmem:[#allocation8 + $0x3b4] sm:$0xf0] }
 0x16c   :  { %2820 = vmatpush.bf16.msra.mxu1 %v4300_v28  ;;  %v1808_v18 = vpop.f32.mrf.mxu3  ;;  %v348_v1 = vperm.slane %v5129_v0, 3  ;;  %v4408_v28 = vor.u32 %v5036_v3, %v4407_v2  ;;  %v4568_v55 = vor.u32 %v5076_v53, %v4567_v44  ;;  %v4535_v0 = vld [vmem:[#allocation8 + $0x368] sm:$0xf]  ;;  %v5054_v44 = vld [vmem:[#allocation8 + $0x30c] sm:$0xf] }
 0x16d   :  { %v5026_v18 = vld [vmem:[#allocation8 + $0x22c] sm:$0xf]  ;;  %v4489_v53 = vld [vmem:[#allocation8 + $0x318] sm:$0xf0] }
 0x16e   :  { %v1781_v4 = vadd.f32 %v5485_v11, %v348_v1  ;;  %v5068_v1 = vld [vmem:[#allocation8 + $0x374] sm:$0xf0] }
 0x16f   :  { %2808 = vmatpush.bf16.msra.mxu0 %v4156_v10  ;;  %2781 = vmatpush.bf16.msrb.mxu2 %v4424_v19  ;;  %v4377_v19 = vld [vmem:[#allocation8 + $0x238] sm:$0xf0]  ;;  %v4536_v3 = vor.u32 %v5068_v1, %v4535_v0  ;;  %v5090_v0 = vld [vmem:[#allocation11 + $0x28] sm:$0xff] }
 0x170   :  { %2821 = vmatpush.bf16.msra.mxu1 %v4284_v60  ;;  %v1794_v52 = vadd.f32 %v1793_v32, %v1781_v4  ;;  %v4380_v2 = vor.u32 %v5026_v18, %v4377_v19  ;;  %v4361_v4 = vld [vmem:[#allocation8 + $0x218] sm:$0xf0]  ;;  %v5091_v18 = vld [vmem:[#allocation11 + $0x30] sm:$0xff] }
 0x172   :  { %2734 = vmatmul.bf16.vlgmr.msra.gmra.mxu2 %v5487_v25  ;;  %v1807_v9 = vadd.f32 %v1806_v33, %v1794_v52  ;;  %v4599_v33 = vld [vmem:[#allocation8 + $0x3e8] sm:$0xf] }
 0x173   :  { %2809 = vmatpush.bf16.msra.mxu0 %v4140_v43  ;;  %2782 = vmatpush.bf16.msrb.mxu2 %v4408_v28  ;;  %v4460_v43 = vor.u32 %v5046_v27, %v4457_v17  ;;  %v4600_v36 = vor.u32 %v5084_v40, %v4599_v33  ;;  %v5022_v28 = vld [vmem:[#allocation8 + $0x20c] sm:$0xf]  ;;  %v4585_v17 = vld [vmem:[#allocation8 + $0x3d8] sm:$0xf0] }
 0x174   :  { %2822 = vmatpush.bf16.msra.mxu1 %v4268_v20  ;;  %v4441_v20 = vld [vmem:[#allocation8 + $0x2b8] sm:$0xf0]  ;;  %v4364_v52 = vor.u32 %v5022_v28, %v4361_v4  ;;  %v5078_v27 = vld [vmem:[#allocation8 + $0x3cc] sm:$0xf]  ;;  %v5087_v4 = vld [vmem:[#allocation11 + $0x10] sm:$0xff] }
 0x175   :  { %v4444_v41 = vor.u32 %v5042_v31, %v4441_v20  ;;  %v4553_v31 = vld [vmem:[#allocation8 + $0x398] sm:$0xf0]  ;;  %v5066_v33 = vld [vmem:[#allocation8 + $0x36c] sm:$0xf] }
 0x176   :  { %v4537_v40 = vld [vmem:[#allocation8 + $0x378] sm:$0xf0] }
 0x177   :  { %2810 = vmatpush.bf16.msra.mxu0 %v4124_v37  ;;  %2783 = vmatpush.bf16.msrb.mxu2 %v4392_v6  ;;  %v5064_v6 = vld [vmem:[#allocation8 + $0x354] sm:$0xf0] }
 0x178   :  { %2823 = vmatpush.bf16.msra.mxu1 %v4252_v50  ;;  %v5034_v50 = vld [vmem:[#allocation8 + $0x26c] sm:$0xf]  ;;  %v4520_v7 = vor.u32 %v5064_v6, %v4519_v59 }
 0x179   :  { %v4412_v54 = vor.u32 %v5034_v50, %v4409_v51  ;;  %v5086_v6 = vld [vmem:[#allocation11 + $0x8] sm:$0xff] }
 0x17b   :  { %2811 = vmatpush.bf16.msra.mxu0 %v4108_v61  ;;  %v1819_v10 = vpop.f32.mrf.mxu0  ;;  %2784 = vmatpush.bf16.msrb.mxu2 %v4376_v8  ;;  %v5072_v61 = vld [vmem:[#allocation8 + $0x394] sm:$0xf0] }
 0x17c   :  { %2824 = vmatpush.bf16.msra.mxu1 %v4236_v22  ;;  %v1832_v11 = vpop.f32.mrf.mxu1  ;;  %v1820_v60 = vadd.f32 %v1819_v10, %v1807_v9  ;;  %v4396_v22 = vor.u32 %v5030_v56, %v4393_v57  ;;  %v4552_v48 = vor.u32 %v5072_v61, %v4551_v46  ;;  %v5060_v8 = vld [vmem:[#allocation8 + $0x334] sm:$0xf0]  ;;  %v5499_v10 = vld [vmem:[#allocation10] sm:$0xf] }
 0x17d   :  { %v4504_v9 = vor.u32 %v5060_v8, %v4503_v62  ;;  %v2002_v56 = vperm.slane %v5499_v10, 2  ;;  %v5092_v46 = vld [vmem:[#allocation11 + $0x38] sm:$0xff]  ;;  %v2003_v59 = vperm.slane %v5499_v10, 3 }
 0x17e   :  { %2812 = vmatmul.bf16.vlgmr.msra.gmra.mxu0 %v5454_v35  ;;  %v4473_v35 = vld [vmem:[#allocation8 + $0x2f8] sm:$0xf0]  ;;  %v1833_v23 = vadd.f32 %v1832_v11, %v1820_v60  ;;  %v5056_v11 = vld [vmem:[#allocation8 + $0x314] sm:$0xf0]  ;;  %v2000_v60 = vperm.slane %v5499_v10, 0 }
 0x17f   :  { %2825 = vmatmul.bf16.vlgmr.msra.gmra.mxu1 %v5459_v21  ;;  %v4476_v21 = vor.u32 %v5050_v14, %v4473_v35  ;;  %2785 = vmatpush.bf16.msrb.mxu2 %v4360_v15  ;;  %v5082_v14 = vld [vmem:[#allocation8 + $0x3ec] sm:$0xf]  ;;  %v4601_v35 = vld [vmem:[#allocation8 + $0x3f8] sm:$0xf0]  ;;  %v4488_v15 = vor.u32 %v5056_v11, %v4487_v13  ;;  %v5097_v13 = vld [vmem:[#allocation11 + $0x60] sm:$0xff] }
 0x180   :  { %3124 = vmatpush.bf16.msrb.mxu0 %v5092_v46 }
 0x182   :  { %2786 = vmatmul.bf16.vlgmr.msrb.gmra.mxu2 %v5487_v25 }
 0x183   :  { %v1845_v24 = vpop.f32.mrf.mxu2  ;;  %2830 = vmatpush.bf16.msra.mxu2 %v4476_v21  ;;  %v1821_v29 = vpop.f32.mrf.mxu0  ;;  %v4604_v21 = vor.u32 %v5082_v14, %v4601_v35  ;;  %v5096_v14 = vld [vmem:[#allocation11 + $0x58] sm:$0xff] }
 0x184   :  { %v1846_v16 = vadd.f32 %v1845_v24, %v1833_v23  ;;  %v1858_v26 = vpop.f32.mrf.mxu3  ;;  %v1834_v30 = vpop.f32.mrf.mxu1  ;;  %v5074_v29 = vld [vmem:[#allocation8 + $0x3ac] sm:$0xf]  ;;  %3125 = vmatpush.bf16.msrb.mxu0 %v5091_v18  ;;  %v5108_v35 = vld [vmem:[#allocation11 + $0xb8] sm:$0xff] }
 0x185   :  { %v5070_v30 = vld [vmem:[#allocation8 + $0x38c] sm:$0xf] }
 0x186   :  { %v1859_v32 = vadd.f32 %v1858_v26, %v1846_v16  ;;  %v4588_v16 = vor.u32 %v5078_v27, %v4585_v17  ;;  %v5094_v17 = vld [vmem:[#allocation11 + $0x48] sm:$0xff] }
 0x187   :  { %2831 = vmatpush.bf16.msra.mxu2 %v4460_v43  ;;  %v4569_v43 = vld [vmem:[#allocation8 + $0x3b8] sm:$0xf0] }
 0x188   :  { %v1865_v34 = vmax.f32 %v1859_v32, 0.0  ;;  %v4556_v32 = vor.u32 %v5070_v30, %v4553_v31  ;;  %3126 = vmatpush.bf16.msrb.mxu0 %v5090_v0 }
 0x18a   :  { %v5495_v42 = vpack.c.bf16 %v1865_v34, %v1865_v34  ;;  %v2001_v34 = vperm.slane %v5499_v10, 1  ;;  %v5107_v10 = vld [vmem:[#allocation11 + $0xb0] sm:$0xff] }
 0x18b   :  { %v1847_v37 = vpop.f32.mrf.mxu2  ;;  %2832 = vmatpush.bf16.msra.mxu2 %v4444_v41  ;;  %v4540_v41 = vor.u32 %v5066_v33, %v4537_v40 }
 0x18c   :  { %v1860_v47 = vpop.f32.mrf.mxu3  ;;  %2695 = vmatmul.bf16.vlgmr.msrb.gmra.mxu3 %v5495_v42 }
 0x18d   :  { %2791 = vmatpush.bf16.msrb.mxu3 %v4600_v36  ;;  %v5058_v47 = vld [vmem:[#allocation8 + $0x32c] sm:$0xf] }
 0x18f   :  { %2833 = vmatpush.bf16.msra.mxu2 %v4428_v49  ;;  %v4505_v49 = vld [vmem:[#allocation8 + $0x338] sm:$0xf0] }
 0x190   :  { %v4508_v50 = vor.u32 %v5058_v47, %v4505_v49 }
 0x191   :  { %2792 = vmatpush.bf16.msrb.mxu3 %v4584_v63 }
 0x193   :  { %2834 = vmatpush.bf16.msra.mxu2 %v4412_v54  ;;  %v4492_v54 = vor.u32 %v5054_v44, %v4489_v53  ;;  %v5111_v53 = vld [vmem:[#allocation11 + $0xd0] sm:$0xff] }
 0x195   :  { %2793 = vmatpush.bf16.msrb.mxu3 %v4568_v55 }
 0x197   :  { %2835 = vmatpush.bf16.msra.mxu2 %v4396_v22 }
 0x199   :  { %2794 = vmatpush.bf16.msrb.mxu3 %v4552_v48 }
 0x19b   :  { %v2657_v5 = vpop.f32.mrf.mxu0  ;;  %2836 = vmatpush.bf16.msra.mxu2 %v4380_v2  ;;  %v5089_v2 = vld [vmem:[#allocation11 + $0x20] sm:$0xff] }
 0x19c   :  { %2747 = vmatmul.bf16.vlgmr.msra.gmra.mxu3 %v5495_v42  ;;  %v2658_v23 = vadd.f32 %v2657_v5, %v2000_v60  ;;  %3127 = vmatpush.bf16.msrb.mxu0 %v5089_v2  ;;  %v5099_v5 = vld [vmem:[#allocation11 + $0x70] sm:$0xff] }
 0x19d   :  { %2795 = vmatpush.bf16.msrb.mxu3 %v4536_v3  ;;  %v5100_v3 = vld [vmem:[#allocation11 + $0x78] sm:$0xff]  ;;  %v5095_v60 = vld [vmem:[#allocation11 + $0x50] sm:$0xff] }
 0x19e   :  { %3137 = vmatpush.bf16.msrb.mxu1 %v5100_v3 }
 0x19f   :  { %2837 = vmatpush.bf16.msra.mxu2 %v4364_v52  ;;  %v5098_v52 = vld [vmem:[#allocation11 + $0x68] sm:$0xff] }
 0x1a1   :  { %2796 = vmatpush.bf16.msrb.mxu3 %v4520_v7 }
 0x1a2   :  { %2838 = vmatmul.bf16.vlgmr.msra.gmra.mxu2 %v5487_v25  ;;  %v2670_v24 = vpop.f32.mrf.mxu1  ;;  %v4572_v25 = vor.u32 %v5074_v29, %v4569_v43  ;;  %3138 = vmatpush.bf16.msrb.mxu1 %v5099_v5  ;;  %v5105_v29 = vld [vmem:[#allocation11 + $0xa0] sm:$0xff]  ;;  %v5104_v43 = vld [vmem:[#allocation11 + $0x98] sm:$0xff] }
 0x1a3   :  { %v2659_v12 = vpop.f32.mrf.mxu0  ;;  %v5503_v26 = vadd.f32 %v2670_v24, %v2658_v23  ;;  %3150 = vmatpush.bf16.msrb.mxu2 %v5108_v35  ;;  %v5106_v23 = vld [vmem:[#allocation11 + $0xa8] sm:$0xff] }
 0x1a4   :  { %v5085_v12 = vld [vmem:[#allocation11] sm:$0xff] }
 0x1a5   :  { %2797 = vmatpush.bf16.msrb.mxu3 %v4504_v9 }
 0x1a6   :  { %3139 = vmatpush.bf16.msrb.mxu1 %v5098_v52 }
 0x1a7   :  { %3151 = vmatpush.bf16.msrb.mxu2 %v5107_v10 }
 0x1a9   :  { %2798 = vmatpush.bf16.msrb.mxu3 %v4488_v15 }
 0x1aa   :  { %v2672_v20 = vpop.f32.mrf.mxu1  ;;  %3140 = vmatpush.bf16.msrb.mxu1 %v5097_v13 }
 0x1ab   :  { %3152 = vmatpush.bf16.msrb.mxu2 %v5106_v23  ;;  %v5102_v20 = vld [vmem:[#allocation11 + $0x88] sm:$0xff] }
 0x1ac   :  { %2799 = vmatmul.bf16.vlgmr.msrb.gmra.mxu3 %v5495_v42 }
 0x1ad   :  { %2843 = vmatpush.bf16.msra.mxu3 %v4604_v21 }
 0x1ae   :  { %3141 = vmatpush.bf16.msrb.mxu1 %v5096_v14 }
 0x1af   :  { %3153 = vmatpush.bf16.msrb.mxu2 %v5105_v29 }
 0x1b1   :  { %2844 = vmatpush.bf16.msra.mxu3 %v4588_v16  ;;  %v5093_v16 = vld [vmem:[#allocation11 + $0x40] sm:$0xff] }
 0x1b2   :  { %3142 = vmatpush.bf16.msrb.mxu1 %v5095_v60 }
 0x1b3   :  { %3154 = vmatpush.bf16.msrb.mxu2 %v5104_v43 }
 0x1b5   :  { %2845 = vmatpush.bf16.msra.mxu3 %v4572_v25  ;;  %v5103_v25 = vld [vmem:[#allocation11 + $0x90] sm:$0xff] }
 0x1b6   :  { %3143 = vmatpush.bf16.msrb.mxu1 %v5094_v17 }
 0x1b7   :  { %3155 = vmatpush.bf16.msrb.mxu2 %v5103_v25 }
 0x1b9   :  { %2846 = vmatpush.bf16.msra.mxu3 %v4556_v32 }
 0x1ba   :  { %3144 = vmatpush.bf16.msrb.mxu1 %v5093_v16 }
 0x1bb   :  { %v2709_v36 = vpop.f32.mrf.mxu0  ;;  %3156 = vmatpush.bf16.msrb.mxu2 %v5102_v20 }
 0x1bc   :  { %v2710_v58 = vadd.f32 %v2709_v36, %v2001_v34  ;;  %v2722_v37 = vpop.f32.mrf.mxu1  ;;  %v5116_v36 = vld [vmem:[#allocation11 + $0xf8] sm:$0xff] }
 0x1bd   :  { %2847 = vmatpush.bf16.msra.mxu3 %v4540_v41  ;;  %v5101_v41 = vld [vmem:[#allocation11 + $0x80] sm:$0xff] }
 0x1be   :  { %v5507_v63 = vadd.f32 %v2722_v37, %v2710_v58  ;;  %v5113_v37 = vld [vmem:[#allocation11 + $0xe0] sm:$0xff] }
 0x1bf   :  { %3157 = vmatpush.bf16.msrb.mxu2 %v5101_v41 }
 0x1c1   :  { %2848 = vmatpush.bf16.msra.mxu3 %v4524_v45  ;;  %v5114_v45 = vld [vmem:[#allocation11 + $0xe8] sm:$0xff] }
 0x1c3   :  { %v2711_v51 = vpop.f32.mrf.mxu0 }
 0x1c4   :  { %v2724_v55 = vpop.f32.mrf.mxu1 }
 0x1c5   :  { %2849 = vmatpush.bf16.msra.mxu3 %v4508_v50  ;;  %v5112_v50 = vld [vmem:[#allocation11 + $0xd8] sm:$0xff] }
 0x1c9   :  { %2850 = vmatpush.bf16.msra.mxu3 %v4492_v54 }
 0x1cc   :  { %2851 = vmatmul.bf16.vlgmr.msra.gmra.mxu3 %v5495_v42  ;;  %v5088_v42 = vld [vmem:[#allocation11 + $0x18] sm:$0xff] }
 0x1cd   :  { %3128 = vmatpush.bf16.msrb.mxu0 %v5088_v42  ;;  %3163 = vmatpush.bf16.msrb.mxu3 %v5116_v36 }
 0x1d1   :  { %3129 = vmatpush.bf16.msrb.mxu0 %v5087_v4  ;;  %3164 = vmatpush.bf16.msrb.mxu3 %v5115_v39 }
 0x1d5   :  { %3130 = vmatpush.bf16.msrb.mxu0 %v5086_v6  ;;  %3165 = vmatpush.bf16.msrb.mxu3 %v5114_v45 }
 0x1d9   :  { %3131 = vmatpush.bf16.msrb.mxu0 %v5085_v12  ;;  %3166 = vmatpush.bf16.msrb.mxu3 %v5113_v37 }
 0x1db   :  { %v2761_v57 = vpop.f32.mrf.mxu0 }
 0x1dc   :  { %v2762_v61 = vadd.f32 %v2761_v57, %v2002_v56  ;;  %v2774_v22 = vpop.f32.mrf.mxu1  ;;  %v5110_v56 = vld [vmem:[#allocation11 + $0xc8] sm:$0xff] }
 0x1dd   :  { %3167 = vmatpush.bf16.msrb.mxu3 %v5112_v50 }
 0x1de   :  { %v5511_v48 = vadd.f32 %v2774_v22, %v2762_v61  ;;  %v5109_v61 = vld [vmem:[#allocation11 + $0xc0] sm:$0xff] }
 0x1e1   :  { %3168 = vmatpush.bf16.msrb.mxu3 %v5111_v53 }
 0x1e3   :  { %v2763_v19 = vpop.f32.mrf.mxu0 }
 0x1e4   :  { %v2776_v1 = vpop.f32.mrf.mxu1 }
 0x1e5   :  { %v2683_v28 = vpop.f32.mrf.mxu2  ;;  %3169 = vmatpush.bf16.msrb.mxu3 %v5110_v56 }
 0x1e6   :  { %v2684_v31 = vadd.f32 %v2683_v28, %v5503_v26 }
 0x1e9   :  { %3170 = vmatpush.bf16.msrb.mxu3 %v5109_v61 }
 0x1ed   :  { %v2685_v62 = vpop.f32.mrf.mxu2 }
 0x1ee   :  { %v5128_v62 = vld [vmem:[%s5532_s6] ss:$0 sm:$0xff] }
 0x1f5   :  { %v2735_v21 = vpop.f32.mrf.mxu2 }
 0x1f6   :  { %v2736_v26 = vadd.f32 %v2735_v21, %v5507_v63 }
 0x1fb   :  { %v2813_v7 = vpop.f32.mrf.mxu0 }
 0x1fc   :  { %v2814_v8 = vadd.f32 %v2813_v7, %v2003_v59  ;;  %v2826_v9 = vpop.f32.mrf.mxu1 }
 0x1fd   :  { %v2737_v24 = vpop.f32.mrf.mxu2 }
 0x1fe   :  { %v5514_v11 = vadd.f32 %v2826_v9, %v2814_v8 }
 0x203   :  { %v2815_v15 = vpop.f32.mrf.mxu0 }
 0x204   :  { %v2828_v27 = vpop.f32.mrf.mxu1 }
 0x205   :  { %v2787_v30 = vpop.f32.mrf.mxu2 }
 0x206   :  { %v2788_v57 = vadd.f32 %v2787_v30, %v5511_v48 }
 0x20d   :  { %v2789_v40 = vpop.f32.mrf.mxu2 }
 0x20f   :  { %v2696_v32 = vpop.f32.mrf.mxu3 }
 0x210   :  { %v2697_v33 = vadd.f32 %v2696_v32, %v2684_v31 }
 0x212   :  { %v2856_v34 = vmax.f32 %v2697_v33, 0.0 }
 0x214   :  { %v2860_v38 = vpack.c.bf16 %v2856_v34, %v2856_v34 }
 0x216   :  { %3132 = vmatmul.bf16.vlgmr.msrb.gmra.mxu0 %v2860_v38 }
 0x217   :  { %v2698_v58 = vpop.f32.mrf.mxu3 }
 0x21f   :  { %v2748_v47 = vpop.f32.mrf.mxu3 }
 0x220   :  { %v2749_v49 = vadd.f32 %v2748_v47, %v2736_v26 }
 0x222   :  { %v2857_v51 = vmax.f32 %v2749_v49, 0.0 }
 0x224   :  { %v2861_v44 = vpack.c.bf16 %v2857_v51, %v2857_v51 }
 0x225   :  { %v2839_v54 = vpop.f32.mrf.mxu2 }
 0x226   :  { %3145 = vmatmul.bf16.vlgmr.msrb.gmra.mxu1 %v2861_v44  ;;  %v2840_v1 = vadd.f32 %v2839_v54, %v5514_v11 }
 0x227   :  { %v2750_v55 = vpop.f32.mrf.mxu3 }
 0x22d   :  { %v2841_v46 = vpop.f32.mrf.mxu2 }
 0x22f   :  { %v2800_v22 = vpop.f32.mrf.mxu3 }
 0x230   :  { %v2801_v63 = vadd.f32 %v2800_v22, %v2788_v57 }
 0x232   :  { %v2858_v18 = vmax.f32 %v2801_v63, 0.0 }
 0x234   :  { %v2862_v19 = vpack.c.bf16 %v2858_v18, %v2858_v18 }
 0x236   :  { %3158 = vmatmul.bf16.vlgmr.msrb.gmra.mxu2 %v2862_v19 }
 0x237   :  { %v2802_v0 = vpop.f32.mrf.mxu3 }
 0x24f   :  { %v2852_v2 = vpop.f32.mrf.mxu3 }
 0x250   :  { %v2853_v3 = vadd.f32 %v2852_v2, %v2840_v1 }
 0x252   :  { %v2859_v42 = vmax.f32 %v2853_v3, 0.0 }
 0x254   :  { %v2863_v28 = vpack.c.bf16 %v2859_v42, %v2859_v42 }
 0x256   :  { %3171 = vmatmul.bf16.vlgmr.msrb.gmra.mxu3 %v2863_v28 }
 0x257   :  { %v2854_v4 = vpop.f32.mrf.mxu3 }
 0x293   :  { %v3133_v5 = vpop.f32.mrf.mxu0 }
 0x294   :  { %v3134_v8 = vadd.f32 %v5128_v62, %v3133_v5 }
 0x29b   :  { %v3135_v59 = vpop.f32.mrf.mxu0 }
 0x2a3   :  { %v3146_v48 = vpop.f32.mrf.mxu1 }
 0x2a4   :  { %v3147_v9 = vadd.f32 %v3146_v48, %v3134_v8 }
 0x2ab   :  { %v3148_v6 = vpop.f32.mrf.mxu1 }
 0x2b9   :  { %v3159_v52 = vpop.f32.mrf.mxu2 }
 0x2ba   :  { %v3160_v12 = vadd.f32 %v3159_v52, %v3147_v9 }
 0x2c1   :  { %v3161_v7 = vpop.f32.mrf.mxu2 }
 0x2d9   :  { %v3172_v13 = vpop.f32.mrf.mxu3 }
 0x2da   :  { %v3173_v11 = vadd.f32 %v3172_v13, %v3160_v12 }
 0x2dc   :  { %3176 = vst [vmem:[#allocation13] sm:$0xff] %v3173_v11 }
 0x2dd   :  { %3187 = dma.vmem_to_hbm [thread:$0]  %s3183_s9, 128, %s3185_s12, [#allocation4]  }
 0x2e1   :  { %v3174_v14 = vpop.f32.mrf.mxu3 }
 0x2e2   :  { %5306 = dma.done.wait [#allocation4], 128  }
 0x2e3   :  { %5307 = vsyncadd [#allocation4], 4294967168 }
 0x2e4   :  { %3192 = vsyncpa [#allocation3], 1 }
 0x2e5   :  { %3193 = vsyncpa [#allocation6], 1 }
 0x2e6   :  { %3194 = vsyncpa [#allocation9], 1 }
 0x2e7   :  { %3195 = vsyncpa [#allocation12], 1 }
 0x2e8   :  { %3196 = vsyncpa [#allocation4], 1 }

</bundles_post_ra>
